<compile_context>
chip_gen: v6e
topology: v6e:2x2x1
jax: 0.10.0
libtpu: 0.0.40
codegen_flags: <defaults>
</compile_context>

<pallas_src>
import jax
import jax.numpy as jnp
from jax.experimental import pallas as pl
from jax.experimental.pallas import tpu as pltpu


def _make_ghost_kernel(H, W, C1, PAD):
    HW = H * W

    def kernel(x_ref, w1_ref, b1_ref, wdw_ref, b2_ref, wmask_ref, o_ref, x1pad_ref):
        Cpad = o_ref.shape[-1]

        # ---- primary 1x1 conv + folded BN1 + ReLU (MXU) ----------------------
        # w1_ref holds the folded weight duplicated into lanes [0:C1] and [C1:2*C1],
        # so x1_both carries x1 in both lane ranges (zeros elsewhere; ReLU(0)=0).
        x = x_ref[0]                                            # (HW, Cin)
        x1_both = jnp.maximum(
            jnp.dot(x, w1_ref[...], preferred_element_type=jnp.float32)
            + b1_ref[...], 0.0)                                 # (HW, Cpad)

        # ---- stage x1 into a zero-halo VMEM scratch for the depthwise conv ---
        halo = jnp.zeros((PAD, Cpad), jnp.float32)
        x1pad_ref[pl.ds(0, PAD), :] = halo
        x1pad_ref[pl.ds(PAD + HW, PAD), :] = halo
        x1pad_ref[pl.ds(PAD, HW), :] = x1_both

        # ---- depthwise 3x3 (stride 1, pad 1) + folded BN2 + ReLU (VPU) -------
        mask_l = wmask_ref[:, 0:1]                              # valid when w > 0
        mask_r = wmask_ref[:, 1:2]                              # valid when w < W-1
        acc = jnp.zeros((HW, Cpad), jnp.float32)
        for kh in range(3):
            for kw in range(3):
                d = (kh - 1) * W + (kw - 1)
                tap = x1pad_ref[pl.ds(PAD + d, HW), :]          # x1 shifted by (dh, dw)
                if kw == 0:
                    tap = tap * mask_l
                elif kw == 2:
                    tap = tap * mask_r
                t = kh * 3 + kw
                acc = acc + tap * wdw_ref[t:t + 1, :]
        x2 = jnp.maximum(acc + b2_ref[...], 0.0)                # (HW, Cpad)

        # ---- concat([x1, x2]): x1 in lanes [0:C1], x2 in lanes [C1:2*C1] -----
        lane = jax.lax.broadcasted_iota(jnp.int32, (HW, Cpad), 1)
        o_ref[0] = jnp.where(lane < C1, x1_both, x2)

    return kernel


def ghost_module_forward(x, w1, g1, beta1, m1, v1, wdw, g2, beta2, m2, v2, oup,
                         eps=1e-5):
    """GhostModule forward (eval mode).

    x:   (N, Cin, H, W) f32
    w1:  (C1, Cin, 1, 1)  primary 1x1 conv weight (no bias)
    g1, beta1, m1, v1: (C1,) BN1 gamma/beta/running_mean/running_var
    wdw: (C1, 1, 3, 3)    depthwise 3x3 conv weight (groups=C1, no bias)
    g2, beta2, m2, v2: (C1,) BN2 params
    returns: (N, oup, H, W) f32
    """
    N, Cin, H, W = x.shape
    C1 = w1.shape[0]                       # init_channels
    assert wdw.shape[0] == C1, "ratio=2: new_channels must equal init_channels"
    assert oup <= 2 * C1
    HW = H * W
    Cpad = 128 * pl.cdiv(2 * C1, 128)      # lane-dense output width (>= 128)
    PAD = ((W + 1 + 7) // 8) * 8           # halo rows (>= W + 1), sublane aligned

    # --- fold eval-mode BN1 into the 1x1 conv; duplicate into both lane ranges ---
    s1 = g1 / jnp.sqrt(v1 + eps)
    w1m = (w1[:, :, 0, 0] * s1[:, None]).T.astype(jnp.float32)        # (Cin, C1)
    b1f = (beta1 - m1 * s1).astype(jnp.float32)                        # (C1,)
    w1p = jnp.zeros((Cin, Cpad), jnp.float32)
    w1p = w1p.at[:, :C1].set(w1m).at[:, C1:2 * C1].set(w1m)
    b1p = jnp.zeros((1, Cpad), jnp.float32)
    b1p = b1p.at[0, :C1].set(b1f).at[0, C1:2 * C1].set(b1f)

    # --- fold eval-mode BN2 into the depthwise 3x3; place in lanes [C1:2*C1] ---
    s2 = g2 / jnp.sqrt(v2 + eps)
    wdwf = (wdw[:, 0] * s2[:, None, None]).astype(jnp.float32)         # (C1, 3, 3)
    wdwp = jnp.zeros((9, Cpad), jnp.float32)
    wdwp = wdwp.at[:, C1:2 * C1].set(jnp.transpose(wdwf, (1, 2, 0)).reshape(9, C1))
    b2p = jnp.zeros((1, Cpad), jnp.float32)
    b2p = b2p.at[0, C1:2 * C1].set((beta2 - m2 * s2).astype(jnp.float32))

    # --- left/right image-edge validity masks for the flat (h*W + w) row layout ---
    wcol = jnp.arange(HW, dtype=jnp.int32) % W
    wmask = jnp.stack([wcol > 0, wcol < W - 1], axis=1).astype(jnp.float32)  # (HW, 2)

    # --- NHWC-flat input: rows = spatial positions, lanes = input channels ---
    xf = jnp.transpose(x, (0, 2, 3, 1)).reshape(N, HW, Cin).astype(jnp.float32)

    out = pl.pallas_call(
        _make_ghost_kernel(H, W, C1, PAD),
        out_shape=jax.ShapeDtypeStruct((N, HW, Cpad), jnp.float32),
        grid=(N,),
        in_specs=[
            pl.BlockSpec((1, HW, Cin), lambda n: (n, 0, 0)),
            pl.BlockSpec((Cin, Cpad), lambda n: (0, 0)),
            pl.BlockSpec((1, Cpad), lambda n: (0, 0)),
            pl.BlockSpec((9, Cpad), lambda n: (0, 0)),
            pl.BlockSpec((1, Cpad), lambda n: (0, 0)),
            pl.BlockSpec((HW, 2), lambda n: (0, 0)),
        ],
        out_specs=pl.BlockSpec((1, HW, Cpad), lambda n: (n, 0, 0)),
        scratch_shapes=[pltpu.VMEM((HW + 2 * PAD, Cpad), jnp.float32)],
        compiler_params=pltpu.CompilerParams(
            dimension_semantics=("parallel",)),
    )(xf, w1p, b1p, wdwp, b2p, wmask)

    out = out[:, :, :oup].reshape(N, H, W, oup)
    return jnp.transpose(out, (0, 3, 1, 2))                            # NCHW


def _reference(x, w1, g1, beta1, m1, v1, wdw, g2, beta2, m2, v2, oup, eps=1e-5):
    """Pure-jnp GhostModule reference (eval-mode BN) for checking the kernel."""
    x1 = jnp.einsum("nchw,oc->nohw", x, w1[:, :, 0, 0])
    s1 = g1 / jnp.sqrt(v1 + eps)
    x1 = x1 * s1[None, :, None, None] + (beta1 - m1 * s1)[None, :, None, None]
    x1 = jnp.maximum(x1, 0.0)
    N, C1, H, W = x1.shape
    x1p = jnp.pad(x1, ((0, 0), (0, 0), (1, 1), (1, 1)))
    x2 = jnp.zeros_like(x1)
    for kh in range(3):
        for kw in range(3):
            x2 = x2 + x1p[:, :, kh:kh + H, kw:kw + W] \
                 * wdw[:, 0, kh, kw][None, :, None, None]
    s2 = g2 / jnp.sqrt(v2 + eps)
    x2 = x2 * s2[None, :, None, None] + (beta2 - m2 * s2)[None, :, None, None]
    x2 = jnp.maximum(x2, 0.0)
    return jnp.concatenate([x1, x2], axis=1)[:, :oup]


if __name__ == "__main__":
    key = jax.random.PRNGKey(0)
    keys = jax.random.split(key, 11)

    # GhostModule(inp=4, oup=32, kernel_size=1, ratio=2, dw_size=3, stride=1, relu=True)
    N, Cin, H, W = 2, 4, 16, 16
    oup, ratio = 32, 2
    C1 = -(-oup // ratio)                              # init_channels = 16

    x = jax.random.normal(keys[0], (N, Cin, H, W), dtype=jnp.float32)

    w1 = 0.3 * jax.random.normal(keys[1], (C1, Cin, 1, 1), dtype=jnp.float32)
    g1 = 1.0 + 0.1 * jax.random.normal(keys[2], (C1,), dtype=jnp.float32)
    beta1 = 0.1 * jax.random.normal(keys[3], (C1,), dtype=jnp.float32)
    m1 = 0.1 * jax.random.normal(keys[4], (C1,), dtype=jnp.float32)
    v1 = 1.0 + 0.5 * jax.random.uniform(keys[5], (C1,), dtype=jnp.float32)

    wdw = 0.3 * jax.random.normal(keys[6], (C1, 1, 3, 3), dtype=jnp.float32)
    g2 = 1.0 + 0.1 * jax.random.normal(keys[7], (C1,), dtype=jnp.float32)
    beta2 = 0.1 * jax.random.normal(keys[8], (C1,), dtype=jnp.float32)
    m2 = 0.1 * jax.random.normal(keys[9], (C1,), dtype=jnp.float32)
    v2 = 1.0 + 0.5 * jax.random.uniform(keys[10], (C1,), dtype=jnp.float32)

    out = ghost_module_forward(x, w1, g1, beta1, m1, v1, wdw, g2, beta2, m2, v2, oup)
    out = jax.block_until_ready(out)

    ref = _reference(x, w1, g1, beta1, m1, v1, wdw, g2, beta2, m2, v2, oup)
    assert out.shape == (N, oup, H, W), out.shape
    max_err = float(jnp.max(jnp.abs(out - ref)))
    assert jnp.allclose(out, ref, atol=1e-3, rtol=1e-3), max_err

    print("KERNEL_OK")
</pallas_src>

<mosaic_0001>
module attributes {stable_mosaic.version = 11 : i64} {
  func.func @kernel(%arg0: i32, %arg1: memref<1x256x4xf32, #tpu.memory_space<vmem>>, %arg2: memref<4x128xf32, #tpu.memory_space<vmem>>, %arg3: memref<1x128xf32, #tpu.memory_space<vmem>>, %arg4: memref<9x128xf32, #tpu.memory_space<vmem>>, %arg5: memref<1x128xf32, #tpu.memory_space<vmem>>, %arg6: memref<256x2xf32, #tpu.memory_space<vmem>>, %arg7: memref<1x256x128xf32, #tpu.memory_space<vmem>>, %arg8: memref<304x128xf32, #tpu.memory_space<vmem>>) attributes {dimension_semantics = [#tpu.dimension_semantics<parallel>], iteration_bounds = array<i64: 2>, scalar_prefetch = 0 : i64, scratch_operands = 1 : i64, tpu.core_type = #tpu.core_type<tc>, window_params = [{transform_indices = @transform_0, window_bounds = array<i64: 1, 256, 4>}, {pipeline_mode = #tpu.pipeline_mode<synchronous>, transform_indices = @transform_1, window_bounds = array<i64: 4, 128>}, {pipeline_mode = #tpu.pipeline_mode<synchronous>, transform_indices = @transform_2, window_bounds = array<i64: 1, 128>}, {pipeline_mode = #tpu.pipeline_mode<synchronous>, transform_indices = @transform_3, window_bounds = array<i64: 9, 128>}, {pipeline_mode = #tpu.pipeline_mode<synchronous>, transform_indices = @transform_4, window_bounds = array<i64: 1, 128>}, {pipeline_mode = #tpu.pipeline_mode<synchronous>, transform_indices = @transform_5, window_bounds = array<i64: 256, 2>}, {transform_indices = @transform_6, window_bounds = array<i64: 1, 256, 128>}]} {
    %c0 = arith.constant 0 : index
    %c0_0 = arith.constant 0 : index
    %c0_1 = arith.constant 0 : index
    %0 = vector.load %arg1[%c0, %c0_0, %c0_1] : memref<1x256x4xf32, #tpu.memory_space<vmem>>, vector<1x256x4xf32>
    %1 = vector.shape_cast %0 : vector<1x256x4xf32> to vector<256x4xf32>
    %c0_2 = arith.constant 0 : index
    %c0_3 = arith.constant 0 : index
    %2 = vector.load %arg2[%c0_2, %c0_3] : memref<4x128xf32, #tpu.memory_space<vmem>>, vector<4x128xf32>
    %cst = arith.constant dense<0.000000e+00> : vector<256x128xf32>
    %3 = tpu.matmul %1, %2, %cst {dimension_numbers = #tpu.dot_dimension_numbers<[1], [0], [0], [1], [0, 0, 1, 1], [], []>} : vector<256x4xf32>, vector<4x128xf32>, vector<256x128xf32> -> vector<256x128xf32>
    %c0_4 = arith.constant 0 : index
    %c0_5 = arith.constant 0 : index
    %4 = vector.load %arg3[%c0_4, %c0_5] : memref<1x128xf32, #tpu.memory_space<vmem>>, vector<1x128xf32>
    %5 = vector.broadcast %4 : vector<1x128xf32> to vector<256x128xf32>
    %6 = arith.addf %3, %5 : vector<256x128xf32>
    %cst_6 = arith.constant 0.000000e+00 : f32
    %7 = vector.broadcast %cst_6 : f32 to vector<256x128xf32>
    %8 = arith.maximumf %6, %7 : vector<256x128xf32>
    %cst_7 = arith.constant 0.000000e+00 : f32
    %9 = vector.broadcast %cst_7 : f32 to vector<24x128xf32>
    %c0_8 = arith.constant 0 : index
    %c0_9 = arith.constant 0 : index
    %10 = vector.load %arg8[%c0_8, %c0_9] : memref<304x128xf32, #tpu.memory_space<vmem>>, vector<24x128xf32>
    tpu.vector_store %arg8[%c0_8, %c0_9], %9 {strides = array<i32>} : memref<304x128xf32, #tpu.memory_space<vmem>>, vector<24x128xf32>,
    %c280 = arith.constant 280 : index
    %c0_10 = arith.constant 0 : index
    %11 = vector.load %arg8[%c280, %c0_10] : memref<304x128xf32, #tpu.memory_space<vmem>>, vector<24x128xf32>
    tpu.vector_store %arg8[%c280, %c0_10], %9 {strides = array<i32>} : memref<304x128xf32, #tpu.memory_space<vmem>>, vector<24x128xf32>,
    %c24 = arith.constant 24 : index
    %c0_11 = arith.constant 0 : index
    %12 = vector.load %arg8[%c24, %c0_11] : memref<304x128xf32, #tpu.memory_space<vmem>>, vector<256x128xf32>
    tpu.vector_store %arg8[%c24, %c0_11], %8 {strides = array<i32>} : memref<304x128xf32, #tpu.memory_space<vmem>>, vector<256x128xf32>,
    %c0_12 = arith.constant 0 : index
    %c0_13 = arith.constant 0 : index
    %13 = vector.load %arg6[%c0_12, %c0_13] : memref<256x2xf32, #tpu.memory_space<vmem>>, vector<256x1xf32>
    %c0_14 = arith.constant 0 : index
    %c1 = arith.constant 1 : index
    %14 = vector.load %arg6[%c0_14, %c1] : memref<256x2xf32, #tpu.memory_space<vmem>>, vector<256x1xf32>
    %cst_15 = arith.constant 0.000000e+00 : f32
    %15 = vector.broadcast %cst_15 : f32 to vector<256x128xf32>
    %c7 = arith.constant 7 : index
    %c0_16 = arith.constant 0 : index
    %16 = vector.load %arg8[%c7, %c0_16] : memref<304x128xf32, #tpu.memory_space<vmem>>, vector<256x128xf32>
    %17 = vector.broadcast %13 : vector<256x1xf32> to vector<256x128xf32>
    %18 = arith.mulf %16, %17 : vector<256x128xf32>
    %c0_17 = arith.constant 0 : index
    %c0_18 = arith.constant 0 : index
    %19 = vector.load %arg4[%c0_17, %c0_18] : memref<9x128xf32, #tpu.memory_space<vmem>>, vector<1x128xf32>
    %20 = vector.broadcast %19 : vector<1x128xf32> to vector<256x128xf32>
    %21 = arith.mulf %18, %20 : vector<256x128xf32>
    %22 = arith.addf %15, %21 : vector<256x128xf32>
    %c8 = arith.constant 8 : index
    %c0_19 = arith.constant 0 : index
    %23 = vector.load %arg8[%c8, %c0_19] : memref<304x128xf32, #tpu.memory_space<vmem>>, vector<256x128xf32>
    %c1_20 = arith.constant 1 : index
    %c0_21 = arith.constant 0 : index
    %24 = vector.load %arg4[%c1_20, %c0_21] : memref<9x128xf32, #tpu.memory_space<vmem>>, vector<1x128xf32>
    %25 = vector.broadcast %24 : vector<1x128xf32> to vector<256x128xf32>
    %26 = arith.mulf %23, %25 : vector<256x128xf32>
    %27 = arith.addf %22, %26 : vector<256x128xf32>
    %c9 = arith.constant 9 : index
    %c0_22 = arith.constant 0 : index
    %28 = vector.load %arg8[%c9, %c0_22] : memref<304x128xf32, #tpu.memory_space<vmem>>, vector<256x128xf32>
    %29 = vector.broadcast %14 : vector<256x1xf32> to vector<256x128xf32>
    %30 = arith.mulf %28, %29 : vector<256x128xf32>
    %c2 = arith.constant 2 : index
    %c0_23 = arith.constant 0 : index
    %31 = vector.load %arg4[%c2, %c0_23] : memref<9x128xf32, #tpu.memory_space<vmem>>, vector<1x128xf32>
    %32 = vector.broadcast %31 : vector<1x128xf32> to vector<256x128xf32>
    %33 = arith.mulf %30, %32 : vector<256x128xf32>
    %34 = arith.addf %27, %33 : vector<256x128xf32>
    %c23 = arith.constant 23 : index
    %c0_24 = arith.constant 0 : index
    %35 = vector.load %arg8[%c23, %c0_24] : memref<304x128xf32, #tpu.memory_space<vmem>>, vector<256x128xf32>
    %36 = vector.broadcast %13 : vector<256x1xf32> to vector<256x128xf32>
    %37 = arith.mulf %35, %36 : vector<256x128xf32>
    %c3 = arith.constant 3 : index
    %c0_25 = arith.constant 0 : index
    %38 = vector.load %arg4[%c3, %c0_25] : memref<9x128xf32, #tpu.memory_space<vmem>>, vector<1x128xf32>
    %39 = vector.broadcast %38 : vector<1x128xf32> to vector<256x128xf32>
    %40 = arith.mulf %37, %39 : vector<256x128xf32>
    %41 = arith.addf %34, %40 : vector<256x128xf32>
    %c24_26 = arith.constant 24 : index
    %c0_27 = arith.constant 0 : index
    %42 = vector.load %arg8[%c24_26, %c0_27] : memref<304x128xf32, #tpu.memory_space<vmem>>, vector<256x128xf32>
    %c4 = arith.constant 4 : index
    %c0_28 = arith.constant 0 : index
    %43 = vector.load %arg4[%c4, %c0_28] : memref<9x128xf32, #tpu.memory_space<vmem>>, vector<1x128xf32>
    %44 = vector.broadcast %43 : vector<1x128xf32> to vector<256x128xf32>
    %45 = arith.mulf %42, %44 : vector<256x128xf32>
    %46 = arith.addf %41, %45 : vector<256x128xf32>
    %c25 = arith.constant 25 : index
    %c0_29 = arith.constant 0 : index
    %47 = vector.load %arg8[%c25, %c0_29] : memref<304x128xf32, #tpu.memory_space<vmem>>, vector<256x128xf32>
    %48 = vector.broadcast %14 : vector<256x1xf32> to vector<256x128xf32>
    %49 = arith.mulf %47, %48 : vector<256x128xf32>
    %c5 = arith.constant 5 : index
    %c0_30 = arith.constant 0 : index
    %50 = vector.load %arg4[%c5, %c0_30] : memref<9x128xf32, #tpu.memory_space<vmem>>, vector<1x128xf32>
    %51 = vector.broadcast %50 : vector<1x128xf32> to vector<256x128xf32>
    %52 = arith.mulf %49, %51 : vector<256x128xf32>
    %53 = arith.addf %46, %52 : vector<256x128xf32>
    %c39 = arith.constant 39 : index
    %c0_31 = arith.constant 0 : index
    %54 = vector.load %arg8[%c39, %c0_31] : memref<304x128xf32, #tpu.memory_space<vmem>>, vector<256x128xf32>
    %55 = vector.broadcast %13 : vector<256x1xf32> to vector<256x128xf32>
    %56 = arith.mulf %54, %55 : vector<256x128xf32>
    %c6 = arith.constant 6 : index
    %c0_32 = arith.constant 0 : index
    %57 = vector.load %arg4[%c6, %c0_32] : memref<9x128xf32, #tpu.memory_space<vmem>>, vector<1x128xf32>
    %58 = vector.broadcast %57 : vector<1x128xf32> to vector<256x128xf32>
    %59 = arith.mulf %56, %58 : vector<256x128xf32>
    %60 = arith.addf %53, %59 : vector<256x128xf32>
    %c40 = arith.constant 40 : index
    %c0_33 = arith.constant 0 : index
    %61 = vector.load %arg8[%c40, %c0_33] : memref<304x128xf32, #tpu.memory_space<vmem>>, vector<256x128xf32>
    %c7_34 = arith.constant 7 : index
    %c0_35 = arith.constant 0 : index
    %62 = vector.load %arg4[%c7_34, %c0_35] : memref<9x128xf32, #tpu.memory_space<vmem>>, vector<1x128xf32>
    %63 = vector.broadcast %62 : vector<1x128xf32> to vector<256x128xf32>
    %64 = arith.mulf %61, %63 : vector<256x128xf32>
    %65 = arith.addf %60, %64 : vector<256x128xf32>
    %c41 = arith.constant 41 : index
    %c0_36 = arith.constant 0 : index
    %66 = vector.load %arg8[%c41, %c0_36] : memref<304x128xf32, #tpu.memory_space<vmem>>, vector<256x128xf32>
    %67 = vector.broadcast %14 : vector<256x1xf32> to vector<256x128xf32>
    %68 = arith.mulf %66, %67 : vector<256x128xf32>
    %c8_37 = arith.constant 8 : index
    %c0_38 = arith.constant 0 : index
    %69 = vector.load %arg4[%c8_37, %c0_38] : memref<9x128xf32, #tpu.memory_space<vmem>>, vector<1x128xf32>
    %70 = vector.broadcast %69 : vector<1x128xf32> to vector<256x128xf32>
    %71 = arith.mulf %68, %70 : vector<256x128xf32>
    %72 = arith.addf %65, %71 : vector<256x128xf32>
    %c0_39 = arith.constant 0 : index
    %c0_40 = arith.constant 0 : index
    %73 = vector.load %arg5[%c0_39, %c0_40] : memref<1x128xf32, #tpu.memory_space<vmem>>, vector<1x128xf32>
    %74 = vector.broadcast %73 : vector<1x128xf32> to vector<256x128xf32>
    %75 = arith.addf %72, %74 : vector<256x128xf32>
    %cst_41 = arith.constant 0.000000e+00 : f32
    %76 = vector.broadcast %cst_41 : f32 to vector<256x128xf32>
    %77 = arith.maximumf %75, %76 : vector<256x128xf32>
    %78 = tpu.iota {dimensions = array<i32: 1>} : vector<256x128xi32>
    %c16_i32 = arith.constant 16 : i32
    %79 = vector.broadcast %c16_i32 : i32 to vector<256x128xi32>
    %80 = arith.cmpi slt, %78, %79 : vector<256x128xi32>
    %81 = arith.select %80, %8, %77 : vector<256x128xi1>, vector<256x128xf32>
    %c0_42 = arith.constant 0 : index
    %c0_43 = arith.constant 0 : index
    %c0_44 = arith.constant 0 : index
    %82 = vector.load %arg7[%c0_42, %c0_43, %c0_44] : memref<1x256x128xf32, #tpu.memory_space<vmem>>, vector<1x256x128xf32>
    %83 = vector.shape_cast %82 : vector<1x256x128xf32> to vector<256x128xf32>
    %84 = vector.shape_cast %81 : vector<256x128xf32> to vector<1x256x128xf32>
    tpu.vector_store %arg7[%c0_42, %c0_43, %c0_44], %84 {strides = array<i32>} : memref<1x256x128xf32, #tpu.memory_space<vmem>>, vector<1x256x128xf32>,
    return
  }
  func.func @transform_0(%arg0: i32) -> (i32, i32, i32) {
    %c0_i32 = arith.constant 0 : i32
    %c0_i32_0 = arith.constant 0 : i32
    %c0_i32_1 = arith.constant 0 : i32
    return %arg0, %c0_i32, %c0_i32_0 : i32, i32, i32
  }
  func.func @transform_1(%arg0: i32) -> (i32, i32) {
    %c0_i32 = arith.constant 0 : i32
    %c0_i32_0 = arith.constant 0 : i32
    %c0_i32_1 = arith.constant 0 : i32
    return %c0_i32, %c0_i32_0 : i32, i32
  }
  func.func @transform_2(%arg0: i32) -> (i32, i32) {
    %c0_i32 = arith.constant 0 : i32
    %c0_i32_0 = arith.constant 0 : i32
    %c0_i32_1 = arith.constant 0 : i32
    return %c0_i32, %c0_i32_0 : i32, i32
  }
  func.func @transform_3(%arg0: i32) -> (i32, i32) {
    %c0_i32 = arith.constant 0 : i32
    %c0_i32_0 = arith.constant 0 : i32
    %c0_i32_1 = arith.constant 0 : i32
    return %c0_i32, %c0_i32_0 : i32, i32
  }
  func.func @transform_4(%arg0: i32) -> (i32, i32) {
    %c0_i32 = arith.constant 0 : i32
    %c0_i32_0 = arith.constant 0 : i32
    %c0_i32_1 = arith.constant 0 : i32
    return %c0_i32, %c0_i32_0 : i32, i32
  }
  func.func @transform_5(%arg0: i32) -> (i32, i32) {
    %c0_i32 = arith.constant 0 : i32
    %c0_i32_0 = arith.constant 0 : i32
    %c0_i32_1 = arith.constant 0 : i32
    return %c0_i32, %c0_i32_0 : i32, i32
  }
  func.func @transform_6(%arg0: i32) -> (i32, i32, i32) {
    %c0_i32 = arith.constant 0 : i32
    %c0_i32_0 = arith.constant 0 : i32
    %c0_i32_1 = arith.constant 0 : i32
    return %arg0, %c0_i32, %c0_i32_0 : i32, i32, i32
  }
}

</mosaic_0001>

<bundles_post_ra>
// kernel: tpu_custom_call.1
= control target key start
LH: loop header
LB: loop body
LE: loop exit
PB: predicated region body
PF: predicated region fallthrough
CT: control target
= control target key end

     0   :  { %11 = vsyncpa [#allocation4], 0  ;;  %s4381_s0 = inlined_call_operand.vmem [shape: f32[2,256,4], index: 0, kind: input, shape index: {}]   ;;  %s4382_s1 = inlined_call_operand.vmem [shape: f32[4,128], index: 1, kind: input, shape index: {}]   ;;  %s4383_s2 = inlined_call_operand.vmem [shape: f32[1,128], index: 2, kind: input, shape index: {}]   ;;  %s4384_s3 = inlined_call_operand.vmem [shape: f32[9,128], index: 3, kind: input, shape index: {}]   ;;  %s4385_s4 = inlined_call_operand.vmem [shape: f32[1,128], index: 4, kind: input, shape index: {}]   ;;  %s4386_s5 = inlined_call_operand.vmem [shape: f32[256,2], index: 5, kind: input, shape index: {}]   ;;  %s4387_s6 = inlined_call_operand.hbm [shape: f32[2,256,128], index: 6, kind: output, shape index: {}]  }
   0x1   :  { %13 = vsyncpa [#allocation4 + $0x1], 0  ;;  %s2557_s21 = smov 0   ;;  %s2559_s22 = smov 0  }
   0x2   :  { %s2561_s23 = smov 0   ;;  %s2563_s24 = smov 0  }
   0x3 LB: > { %s2578_s25 = sadd.s32 4294967295, %s2514_s24   ;;  %s2231_s26 = sadd.s32 4294967294, %s2514_s24   ;;  %s2514_s24 = sphi %s2563_s24, %s4680_s24   ;;  %s2510_s23 = sphi %s2561_s23, %s4679_s23   ;;  %s2506_s22 = sphi %s2559_s22, %s4678_s22   ;;  %s2502_s21 = sphi %s2557_s21, %s4677_s21  }
   0x4   : > { %s2582_s27 = sadd.s32 1, %s2514_s24   ;;  %s157_s28 = sadd.s32 1, %s2510_s23 }
   0x5   : > { %s154_s29 = ssub.s32 %s2514_s24, %s2582_s27  ;;  %p167_p0 = scmp.ne.s32.totalorder %s2510_s23, %s2506_s22 }
   0x6   : > { %p155_p1 = scmp.eq.s32.totalorder %s154_s29, 0  ;;  %p168_p2 = scmp.eq.s32.totalorder %s2578_s25, 1 }
   0x7   : > { %p173_p3 = scmp.ne.s32.totalorder %s2506_s22, %s2502_s21  ;;  %p174_p4 = scmp.eq.s32.totalorder %s2231_s26, 1 }
   0x8   : > { %s2593_s30 = scalar_select %p155_p1, %s2510_s23, %s157_s28  }
   0x9   : > { %p2595_p5 = por %p168_p2, %p167_p0  ;;  %p2599_p6 = por %p174_p4, %p173_p3 }
   0xa   : > { %p2234_p7 = scmp.ge.s32.totalorder %s2514_s24, 1  ;;  %p215_p8 = scmp.lt.s32.totalorder %s2514_s24, 3 }
   0xc   : > { %p216_p9 = pnand %p2234_p7, %p215_p8 }
   0xe   : > { %219 = sbr.rel (%p216_p9) target bundleno = 477 (0x1dd), region = 44 }
  0x13   : > { %v2608_v0 = vld [vmem:[%s4386_s5 + $0x10] sm:$0xff]  ;;  %v2613_v1 = vld [vmem:[%s4386_s5] sm:$0xff]  ;;  %vm387_vm0 = vcmask 1043456   ;;  %p245_p10 = scmp.lt.s32.totalorder %s2578_s25, 1  ;;  %v2516_v2 = vmov 0   ;;  %v2625_v4 = vld [vmem:[%s4386_s5 + $0x18] sm:$0xff] }
  0x14   : > { %2419 = vset.pattern.permute.xlu1 %v2516_v2  ;;  %2418 = vset.pattern.permute.xlu0 %v2516_v2  ;;  %v282_v3 = vld [vmem:[%s4382_s1] sm:$0xf]  ;;  %v2630_v5 = vld [vmem:[%s4386_s5 + $0x8] sm:$0xff]  ;;  %v2517_v6 = vmov 0.0   ;;  %vm290_vm1 = vcmask 31744   ;;  %v2674_v19 = vld [vmem:[%s4386_s5 + $0x38] sm:$0xff] }
  0x15   : > { %762 = vperm.xlu1 %2419, %v2608_v0   ;;  %752 = vperm.xlu0 %2418, %v2613_v1   ;;  %s246_s15 = scalar_select %p245_p10, %s2578_s25, 1  ;;  %648 = vst [vmem:[#allocation2] sm:$0xff] %v2517_v6  ;;  %649 = vst [vmem:[#allocation2 + $0x8] sm:$0xff] %v2517_v6  ;;  %v2644_v7 = vld [vmem:[%s4386_s5 + $0x28] sm:$0xff]  ;;  %v2649_v8 = vld [vmem:[%s4386_s5 + $0x20] sm:$0xff] }
  0x16   : > { %2322 = vmatprep.subr.msk.mxu0 %vm387_vm0, %v282_v3  ;;  %2372 = vmatprep.subr.msk.mxu1 %vm387_vm0, %v282_v3  ;;  %650 = vst [vmem:[#allocation2 + $0x10] sm:$0xff] %v2517_v6  ;;  %651 = vst [vmem:[#allocation2 + $0x118] sm:$0xff] %v2517_v6  ;;  %v2679_v20 = vld [vmem:[%s4386_s5 + $0x30] sm:$0xff]  ;;  %v2694_v25 = vld [vmem:[%s4386_s5 + $0x48] sm:$0xff]  ;;  %s242_s12 = sand.u32 1, %s2506_s22   ;;  %s2288_s28 = sshll.u32 %s2578_s25, 12 }
  0x17   : > { %652 = vst [vmem:[#allocation2 + $0x120] sm:$0xff] %v2517_v6  ;;  %653 = vst [vmem:[#allocation2 + $0x128] sm:$0xff] %v2517_v6  ;;  %2323 = vmatpush3.msk.msra.mxu0 %vm387_vm0, %v282_v3  ;;  %2373 = vmatpush3.msk.msra.mxu1 %vm387_vm0, %v282_v3  ;;  %s2287_s20 = sshll.u32 %s246_s15, 8  ;;  %v2699_v26 = vld [vmem:[%s4386_s5 + $0x40] sm:$0xff]  ;;  %v2714_v31 = vld [vmem:[%s4386_s5 + $0x58] sm:$0xff]  ;;  %s4332_s13 = scalar_lea.hbm %s4387_s6, %s2288_s28 }
  0x18   : > { %s2639_s29 = scalar_lea.vmem %s4381_s0, %s2287_s20  ;;  %v2719_v32 = vld [vmem:[%s4386_s5 + $0x50] sm:$0xff]  ;;  %v2734_v37 = vld [vmem:[%s4386_s5 + $0x68] sm:$0xff]  ;;  %v2739_v38 = vld [vmem:[%s4386_s5 + $0x60] sm:$0xff]  ;;  %s4341_s25 = scalar_lea.sflag [#allocation4], %s242_s12 }
  0x19   : > { %767 = vperm.xlu1 %2419, %v2625_v4   ;;  %757 = vperm.xlu0 %2418, %v2630_v5   ;;  %v250_v9 = vld [vmem:[%s2639_s29] sm:$0xff]  ;;  %v251_v11 = vld [vmem:[%s2639_s29 + $0x8] sm:$0xff]  ;;  %v252_v13 = vld [vmem:[%s2639_s29 + $0x10] sm:$0xff] }
  0x1a   : > { %v266_v10 = vld [vmem:[%s2639_s29 + $0x80] sm:$0xff]  ;;  %2324 = vmatprep.mubr.msk.f32.mxu0 %vm290_vm1, %v250_v9  ;;  %v267_v12 = vld [vmem:[%s2639_s29 + $0x88] sm:$0xff]  ;;  %v268_v14 = vld [vmem:[%s2639_s29 + $0x90] sm:$0xff]  ;;  %v2518_v9 = vmov 1  }
  0x1b   : > { %2348 = vmatprep.mubr.msk.f32.mxu1 %vm290_vm1, %v266_v10  ;;  %2325 = vmatmul.mubr.msk.f32.vlgmr.msra.gmra.mxu0 %vm290_vm1, %v251_v11  ;;  %v253_v15 = vld [vmem:[%s2639_s29 + $0x18] sm:$0xff]  ;;  %v254_v17 = vld [vmem:[%s2639_s29 + $0x20] sm:$0xff]  ;;  %v255_v21 = vld [vmem:[%s2639_s29 + $0x28] sm:$0xff] }
  0x1c   : > { %2349 = vmatmul.mubr.msk.f32.vlgmr.msra.gmra.mxu1 %vm290_vm1, %v267_v12  ;;  %2327 = vmatprep.mubr.msk.f32.mxu0 %vm290_vm1, %v252_v13  ;;  %v269_v16 = vld [vmem:[%s2639_s29 + $0x98] sm:$0xff]  ;;  %v270_v18 = vld [vmem:[%s2639_s29 + $0xa0] sm:$0xff]  ;;  %v271_v22 = vld [vmem:[%s2639_s29 + $0xa8] sm:$0xff] }
  0x1d   : > { %2351 = vmatprep.mubr.msk.f32.mxu1 %vm290_vm1, %v268_v14  ;;  %777 = vperm.xlu1 %2419, %v2644_v7   ;;  %v256_v23 = vld [vmem:[%s2639_s29 + $0x30] sm:$0xff]  ;;  %v257_v27 = vld [vmem:[%s2639_s29 + $0x38] sm:$0xff]  ;;  %v258_v29 = vld [vmem:[%s2639_s29 + $0x40] sm:$0xff] }
  0x1e   : > { %772 = vperm.xlu0 %2418, %v2649_v8   ;;  %v272_v24 = vld [vmem:[%s2639_s29 + $0xb0] sm:$0xff]  ;;  %v273_v28 = vld [vmem:[%s2639_s29 + $0xb8] sm:$0xff]  ;;  %v274_v30 = vld [vmem:[%s2639_s29 + $0xc0] sm:$0xff] }
  0x1f   : > { %2328 = vmatmul.mubr.msk.f32.gmra.mxu0 %vm290_vm1, %v253_v15  ;;  %v259_v33 = vld [vmem:[%s2639_s29 + $0x48] sm:$0xff]  ;;  %v260_v35 = vld [vmem:[%s2639_s29 + $0x50] sm:$0xff]  ;;  %v261_v39 = vld [vmem:[%s2639_s29 + $0x58] sm:$0xff] }
  0x20   : > { %2352 = vmatmul.mubr.msk.f32.gmra.mxu1 %vm290_vm1, %v269_v16  ;;  %2330 = vmatprep.mubr.msk.f32.mxu0 %vm290_vm1, %v254_v17  ;;  %v275_v34 = vld [vmem:[%s2639_s29 + $0xc8] sm:$0xff]  ;;  %v276_v36 = vld [vmem:[%s2639_s29 + $0xd0] sm:$0xff]  ;;  %v277_v40 = vld [vmem:[%s2639_s29 + $0xd8] sm:$0xff] }
  0x21   : > { %2354 = vmatprep.mubr.msk.f32.mxu1 %vm290_vm1, %v270_v18  ;;  %787 = vperm.xlu1 %2419, %v2674_v19   ;;  %v262_v41 = vld [vmem:[%s2639_s29 + $0x60] sm:$0xff]  ;;  %v2754_v43 = vld [vmem:[%s4386_s5 + $0x78] sm:$0xff]  ;;  %v2759_v44 = vld [vmem:[%s4386_s5 + $0x70] sm:$0xff] }
  0x22   : > { %782 = vperm.xlu0 %2418, %v2679_v20   ;;  %v278_v42 = vld [vmem:[%s2639_s29 + $0xe0] sm:$0xff]  ;;  %v263_v45 = vld [vmem:[%s2639_s29 + $0x68] sm:$0xff]  ;;  %v264_v47 = vld [vmem:[%s2639_s29 + $0x70] sm:$0xff] }
  0x23   : > { %2331 = vmatmul.mubr.msk.f32.gmra.mxu0 %vm290_vm1, %v255_v21  ;;  %v279_v46 = vld [vmem:[%s2639_s29 + $0xe8] sm:$0xff]  ;;  %v280_v48 = vld [vmem:[%s2639_s29 + $0xf0] sm:$0xff]  ;;  %v702_v50 = vld [vmem:[%s4386_s5 + $0x80] sm:$0xff] }
  0x24   : > { %2355 = vmatmul.mubr.msk.f32.gmra.mxu1 %vm290_vm1, %v271_v22  ;;  %2333 = vmatprep.mubr.msk.f32.mxu0 %vm290_vm1, %v256_v23  ;;  %v703_v49 = vld [vmem:[%s4386_s5 + $0x88] sm:$0xff]  ;;  %v265_v51 = vld [vmem:[%s2639_s29 + $0x78] sm:$0xff]  ;;  %v704_v54 = vld [vmem:[%s4386_s5 + $0x90] sm:$0xff] }
  0x25   : > { %2357 = vmatprep.mubr.msk.f32.mxu1 %vm290_vm1, %v272_v24  ;;  %797 = vperm.xlu1 %2419, %v2694_v25   ;;  %v281_v52 = vld [vmem:[%s2639_s29 + $0xf8] sm:$0xff]  ;;  %v707_v55 = vld [vmem:[%s4386_s5 + $0xa8] sm:$0xff]  ;;  %v706_v56 = vld [vmem:[%s4386_s5 + $0xa0] sm:$0xff]  ;;  %s2235_s29 = sshll.u32 %s242_s12, 8 }
  0x26   : > { %792 = vperm.xlu0 %2418, %v2699_v26   ;;  %v705_v53 = vld [vmem:[%s4386_s5 + $0x98] sm:$0xff]  ;;  %v708_v58 = vld [vmem:[%s4386_s5 + $0xb0] sm:$0xff]  ;;  %v711_v59 = vld [vmem:[%s4386_s5 + $0xc8] sm:$0xff]  ;;  %s3228_s15 = scalar_lea.vmem [#allocation3], %s2235_s29  ;;  %s2519_s29 = smov [#allocation3]  }
  0x27   : > { %2334 = vmatmul.mubr.msk.f32.gmra.mxu0 %vm290_vm1, %v257_v27  ;;  %v709_v57 = vld [vmem:[%s4386_s5 + $0xb8] sm:$0xff]  ;;  %v710_v60 = vld [vmem:[%s4386_s5 + $0xc0] sm:$0xff]  ;;  %v712_v62 = vld [vmem:[%s4386_s5 + $0xd0] sm:$0xff]  ;;  %s2169_s9 = sshll.u32 %s3228_s15, 4  ;;  %s2458_s16 = sshll.u32 %s2519_s29, 4  ;;  %s4334_s9 = int_to_ptr.vmem [resolvable:$true] %s2169_s9  ;;  %s2459_s16 = int_to_ptr.vmem [resolvable:$false] %s2458_s16 }
  0x28   : > { %2358 = vmatmul.mubr.msk.f32.gmra.mxu1 %vm290_vm1, %v273_v28  ;;  %2336 = vmatprep.mubr.msk.f32.mxu0 %vm290_vm1, %v258_v29  ;;  %v713_v61 = vld [vmem:[%s4386_s5 + $0xd8] sm:$0xff]  ;;  %v715_v63 = vld [vmem:[%s4386_s5 + $0xe8] sm:$0xff]  ;;  %v714_v2 = vld [vmem:[%s4386_s5 + $0xe0] sm:$0xff]  ;;  %s2454_s14 = scalar_lea.vmem %s4334_s9, 4096  ;;  %s2460_s17 = scalar_lea.vmem %s2459_s16, 8192 }
  0x29   : > { %2360 = vmatprep.mubr.msk.f32.mxu1 %vm290_vm1, %v274_v30  ;;  %807 = vperm.xlu1 %2419, %v2714_v31   ;;  %v717_v3 = vld [vmem:[%s4386_s5 + $0xf8] sm:$0xff]  ;;  %v716_v6 = vld [vmem:[%s4386_s5 + $0xf0] sm:$0xff]  ;;  %p2455_p11 = scmp.ne.s32.totalorder %s4334_s9, %s2454_s14  ;;  %p2461_p0 = scmp.lt.s32.totalorder %s4334_s9, %s2459_s16 }
  0x2a   : > { %802 = vperm.xlu0 %2418, %v2719_v32   ;;  %p2462_p1 = scmp.lt.s32.totalorder %s2460_s17, %s2454_s14 }
  0x2b   : > { %2337 = vmatmul.mubr.msk.f32.gmra.mxu0 %vm290_vm1, %v259_v33  ;;  %p2456_p12 = pnand %p2455_p11, %p2595_p5 }
  0x2c   : > { %2361 = vmatmul.mubr.msk.f32.gmra.mxu1 %vm290_vm1, %v275_v34  ;;  %2339 = vmatprep.mubr.msk.f32.mxu0 %vm290_vm1, %v260_v35  ;;  %p2463_p2 = por %p2462_p1, %p2461_p0 }
  0x2d   : > { %2363 = vmatprep.mubr.msk.f32.mxu1 %vm290_vm1, %v276_v36  ;;  %817 = vperm.xlu1 %2419, %v2734_v37   ;;  %v718_v36 = vld [vmem:[#allocation2 + $0x7] sm:$0xff]  ;;  %p2457_p13 = pneg %p2456_p12 }
  0x2e   : > { %812 = vperm.xlu0 %2418, %v2739_v38  }
  0x2f   : > { %2340 = vmatmul.mubr.msk.f32.gmra.mxu0 %vm290_vm1, %v261_v39  ;;  %v1112_v39 = vld [vmem:[#allocation2 + $0x9] sm:$0xff]  ;;  %p2464_p3 = pnand %p2463_p2, %p2457_p13 }
  0x30   : > { %2364 = vmatmul.mubr.msk.f32.gmra.mxu1 %vm290_vm1, %v277_v40  ;;  %2342 = vmatprep.mubr.msk.f32.mxu0 %vm290_vm1, %v262_v41  ;;  %v2912_v40 = vld [vmem:[%s4384_s3 + $0x1] ss:$0 sm:$0xff] }
  0x31   : > { %2366 = vmatprep.mubr.msk.f32.mxu1 %vm290_vm1, %v278_v42  ;;  %827 = vperm.xlu1 %2419, %v2754_v43   ;;  %v2918_v42 = vld [vmem:[%s4384_s3] ss:$0 sm:$0xff] }
  0x32   : > { %822 = vperm.xlu0 %2418, %v2759_v44  }
  0x33   : > { %2343 = vmatmul.mubr.msk.f32.gmra.mxu0 %vm290_vm1, %v263_v45 }
  0x34   : > { %2367 = vmatmul.mubr.msk.f32.gmra.mxu1 %vm290_vm1, %v279_v46  ;;  %2345 = vmatprep.mubr.msk.f32.mxu0 %vm290_vm1, %v264_v47  ;;  %v1048_v47 = vmul.f32 0.0, %v2912_v40 }
  0x35   : > { %2369 = vmatprep.mubr.msk.f32.mxu1 %vm290_vm1, %v280_v48  ;;  %837 = vperm.xlu1 %2419, %v703_v49   ;;  %v2933_v48 = vld [vmem:[%s4384_s3 + $0x2] ss:$0 sm:$0xff] }
  0x36   : > { %832 = vperm.xlu0 %2418, %v702_v50  }
  0x37   : > { %2346 = vmatmul.mubr.msk.f32.gmra.mxu0 %vm290_vm1, %v265_v51 }
  0x38   : > { %2370 = vmatmul.mubr.msk.f32.gmra.mxu1 %vm290_vm1, %v281_v52 }
  0x39   : > { %847 = vperm.xlu1 %2419, %v705_v53  }
  0x3a   : > { %842 = vperm.xlu0 %2418, %v704_v54  }
  0x3d   : > { %857 = vperm.xlu1 %2419, %v707_v55  }
  0x3e   : > { %852 = vperm.xlu0 %2418, %v706_v56  }
  0x41   : > { %867 = vperm.xlu1 %2419, %v709_v57  }
  0x42   : > { %862 = vperm.xlu0 %2418, %v708_v58  }
  0x45   : > { %877 = vperm.xlu1 %2419, %v711_v59  }
  0x46   : > { %872 = vperm.xlu0 %2418, %v710_v60  }
  0x49   : > { %887 = vperm.xlu1 %2419, %v713_v61  }
  0x4a   : > { %882 = vperm.xlu0 %2418, %v712_v62  }
  0x4d   : > { %897 = vperm.xlu1 %2419, %v715_v63  }
  0x4e   : > { %892 = vperm.xlu0 %2418, %v714_v2  }
  0x51   : > { %907 = vperm.xlu1 %2419, %v717_v3  }
  0x52   : > { %902 = vperm.xlu0 %2418, %v716_v6  }
  0x55   : > { %2421 = vset.pattern.permute.xlu1 %v2518_v9 }
  0x56   : > { %2420 = vset.pattern.permute.xlu0 %v2518_v9  ;;  %1149 = vperm.xlu1 %2421, %v2630_v5  }
  0x57   : > { %1145 = vperm.xlu0 %2420, %v2613_v1  }
  0x5a   : > { %1153 = vperm.xlu1 %2421, %v2608_v0  }
  0x5b   : > { %1157 = vperm.xlu0 %2420, %v2625_v4  }
  0x5e   : > { %1161 = vperm.xlu1 %2421, %v2649_v8  }
  0x5f   : > { %1165 = vperm.xlu0 %2420, %v2644_v7  }
  0x62   : > { %1169 = vperm.xlu1 %2421, %v2679_v20  }
  0x63   : > { %1173 = vperm.xlu0 %2420, %v2674_v19  }
  0x66   : > { %1177 = vperm.xlu1 %2421, %v2699_v26  }
  0x67   : > { %1181 = vperm.xlu0 %2420, %v2694_v25  }
  0x6a   : > { %1185 = vperm.xlu1 %2421, %v2719_v32  }
  0x6b   : > { %1189 = vperm.xlu0 %2420, %v2714_v31  }
  0x6e   : > { %1193 = vperm.xlu1 %2421, %v2739_v38  }
  0x6f   : > { %1197 = vperm.xlu0 %2420, %v2734_v37   ;;  %v719_v37 = vld [vmem:[#allocation2 + $0xf] sm:$0xff] }
  0x72   : > { %1201 = vperm.xlu1 %2421, %v2759_v44  }
  0x73   : > { %1205 = vperm.xlu0 %2420, %v2754_v43   ;;  %v2923_v43 = vld [vmem:[%s4383_s2] ss:$0 sm:$0xff] }
  0x74   : > { %4499 = vst [vmem:[#allocation30_spill] sm:$0xff] %v2923_v43 }
  0x76   : > { %1209 = vperm.xlu1 %2421, %v702_v50  }
  0x77   : > { %1213 = vperm.xlu0 %2420, %v703_v49  }
  0x7a   : > { %1217 = vperm.xlu1 %2421, %v704_v54   ;;  %v2088_v54 = vlaneseq }
  0x7b   : > { %1221 = vperm.xlu0 %2420, %v705_v53  }
  0x7e   : > { %1225 = vperm.xlu1 %2421, %v706_v56  }
  0x7f   : > { %1229 = vperm.xlu0 %2420, %v707_v55  }
  0x82   : > { %1233 = vperm.xlu1 %2421, %v708_v58  }
  0x83   : > { %1237 = vperm.xlu0 %2420, %v709_v57  }
  0x86   : > { %1241 = vperm.xlu1 %2421, %v710_v60  }
  0x87   : > { %1245 = vperm.xlu0 %2420, %v711_v59  }
  0x8a   : > { %1249 = vperm.xlu1 %2421, %v712_v62  }
  0x8b   : > { %1253 = vperm.xlu0 %2420, %v713_v61   ;;  %v2945_v61 = vld [vmem:[%s4384_s3 + $0x4] ss:$0 sm:$0xff] }
  0x8e   : > { %1257 = vperm.xlu1 %2421, %v714_v2  }
  0x8f   : > { %1261 = vperm.xlu0 %2420, %v715_v63  }
  0x90   : > { %v2843_v0 = vpop.permute.xlu1 %762  ;;  %v2845_v1 = vpop.permute.xlu0 %752 }
  0x91   : > { %v910_v41 = vmul.f32 %v2845_v1, %v718_v36  ;;  %v2955_v36 = vand.u32 127, %v2088_v54 }
  0x92   : > { %1265 = vperm.xlu1 %2421, %v716_v6  }
  0x93   : > { %1269 = vperm.xlu0 %2420, %v717_v3   ;;  %v947_v51 = vmul.f32 %v2918_v42, %v910_v41  ;;  %v2953_v3 = vld [vmem:[%s4384_s3 + $0x7] ss:$0 sm:$0xff]  ;;  %vm2090_vm2 = vcmp.lt.s32.totalorder %v2955_v36, 16 }
  0x94   : > { %v2847_v4 = vpop.permute.xlu1 %767  ;;  %v2849_v5 = vpop.permute.xlu0 %757  ;;  %4501 = vst [vmem:[#allocation32_spill] sm:$0xff] %v2953_v3 }
  0x95   : > { %v911_v44 = vmul.f32 %v2849_v5, %v719_v37  ;;  %v1080_v2 = vadd.f32 %v1048_v47, %v947_v51 }
  0x97   : > { %v948_v55 = vmul.f32 %v2918_v42, %v911_v44 }
  0x98   : > { %v2851_v7 = vpop.permute.xlu1 %777 }
  0x99   : > { %v2853_v8 = vpop.permute.xlu0 %772 }
  0x9c   : > { %v2855_v10 = vpop.permute.xlu1 %787 }
  0x9d   : > { %v2857_v11 = vpop.permute.xlu0 %782 }
  0xa0   : > { %v2859_v12 = vpop.permute.xlu1 %797 }
  0xa1   : > { %4475 = vst [vmem:[#allocation6_spill] sm:$0xff] %v2859_v12  ;;  %v2861_v13 = vpop.permute.xlu0 %792 }
  0xa2   : > { %4476 = vst [vmem:[#allocation7_spill] sm:$0xff] %v2861_v13 }
  0xa4   : > { %v2863_v14 = vpop.permute.xlu1 %807 }
  0xa5   : > { %4477 = vst [vmem:[#allocation8_spill] sm:$0xff] %v2863_v14  ;;  %v2865_v15 = vpop.permute.xlu0 %802 }
  0xa6   : > { %4478 = vst [vmem:[#allocation9_spill] sm:$0xff] %v2865_v15 }
  0xa8   : > { %v2867_v16 = vpop.permute.xlu1 %817 }
  0xa9   : > { %4479 = vst [vmem:[#allocation10_spill] sm:$0xff] %v2867_v16  ;;  %v2869_v17 = vpop.permute.xlu0 %812 }
  0xaa   : > { %4480 = vst [vmem:[#allocation11_spill] sm:$0xff] %v2869_v17 }
  0xac   : > { %v2871_v18 = vpop.permute.xlu1 %827 }
  0xad   : > { %4481 = vst [vmem:[#allocation12_spill] sm:$0xff] %v2871_v18  ;;  %v2873_v19 = vpop.permute.xlu0 %822 }
  0xae   : > { %4482 = vst [vmem:[#allocation13_spill] sm:$0xff] %v2873_v19 }
  0xb0   : > { %v2875_v20 = vpop.permute.xlu1 %837 }
  0xb1   : > { %4483 = vst [vmem:[#allocation14_spill] sm:$0xff] %v2875_v20  ;;  %v2877_v21 = vpop.permute.xlu0 %832 }
  0xb2   : > { %4484 = vst [vmem:[#allocation15_spill] sm:$0xff] %v2877_v21 }
  0xb4   : > { %v2879_v22 = vpop.permute.xlu1 %847 }
  0xb5   : > { %4485 = vst [vmem:[#allocation16_spill] sm:$0xff] %v2879_v22  ;;  %v2881_v23 = vpop.permute.xlu0 %842 }
  0xb6   : > { %4486 = vst [vmem:[#allocation17_spill] sm:$0xff] %v2881_v23 }
  0xb8   : > { %v2883_v24 = vpop.permute.xlu1 %857 }
  0xb9   : > { %4487 = vst [vmem:[#allocation18_spill] sm:$0xff] %v2883_v24  ;;  %v2885_v25 = vpop.permute.xlu0 %852 }
  0xba   : > { %4488 = vst [vmem:[#allocation19_spill] sm:$0xff] %v2885_v25 }
  0xbc   : > { %v2887_v26 = vpop.permute.xlu1 %867 }
  0xbd   : > { %4489 = vst [vmem:[#allocation20_spill] sm:$0xff] %v2887_v26  ;;  %v2889_v27 = vpop.permute.xlu0 %862  ;;  %v3051_v26 = vld [vmem:[%s4384_s3 + $0x3] ss:$0 sm:$0xff] }
  0xbe   : > { %4490 = vst [vmem:[#allocation21_spill] sm:$0xff] %v2889_v27 }
  0xc0   : > { %v2893_v29 = vpop.permute.xlu1 %877 }
  0xc1   : > { %v2891_v28 = vpop.permute.xlu0 %872  ;;  %4492 = vst [vmem:[#allocation23_spill] sm:$0xff] %v2893_v29 }
  0xc2   : > { %4491 = vst [vmem:[#allocation22_spill] sm:$0xff] %v2891_v28 }
  0xc4   : > { %v2897_v31 = vpop.permute.xlu1 %887 }
  0xc5   : > { %v2895_v30 = vpop.permute.xlu0 %882  ;;  %4494 = vst [vmem:[#allocation25_spill] sm:$0xff] %v2897_v31 }
  0xc6   : > { %4493 = vst [vmem:[#allocation24_spill] sm:$0xff] %v2895_v30 }
  0xc8   : > { %v2901_v33 = vpop.permute.xlu1 %897 }
  0xc9   : > { %v2899_v32 = vpop.permute.xlu0 %892  ;;  %4496 = vst [vmem:[#allocation27_spill] sm:$0xff] %v2901_v33 }
  0xca   : > { %4495 = vst [vmem:[#allocation26_spill] sm:$0xff] %v2899_v32 }
  0xcc   : > { %v2905_v35 = vpop.permute.xlu1 %907 }
  0xcd   : > { %v2903_v34 = vpop.permute.xlu0 %902  ;;  %4498 = vst [vmem:[#allocation29_spill] sm:$0xff] %v2905_v35 }
  0xce   : > { %4497 = vst [vmem:[#allocation28_spill] sm:$0xff] %v2903_v34 }
  0xd1   : > { %v2926_v45 = vpop.permute.xlu1 %1149 }
  0xd2   : > { %v2907_v38 = vpop.permute.xlu0 %1145 }
  0xd3   : > { %v1272_v46 = vmul.f32 %v2907_v38, %v1112_v39 }
  0xd5   : > { %v1309_v56 = vmul.f32 %v2933_v48, %v1272_v46  ;;  %v2957_v37 = vpop.permute.xlu1 %1153 }
  0xd9   : > { %v3030_v35 = vpop.permute.xlu1 %1161 }
  0xdb   : > { %v2326_v49 = vpop.f32.mrf.mxu0 }
  0xdc   : > { %v2350_v50 = vpop.f32.mrf.mxu1  ;;  %v463_v52 = vadd.f32 %v2326_v49, %v2923_v43  ;;  %v2963_v49 = vadd.f32 %v1048_v47, %v948_v55 }
  0xdd   : > { %v543_v53 = vadd.f32 %v2350_v50, %v2923_v43  ;;  %v457_v59 = vpop.f32.mrf.mxu0  ;;  %v2965_v50 = vadd.f32 %v1309_v56, %v1080_v2  ;;  %v3105_v13 = vpop.permute.xlu1 %1169 }
  0xde   : > { %v2940_v57 = vmax.f32 %v463_v52, 0.0  ;;  %v537_v60 = vpop.f32.mrf.mxu1  ;;  %v458_v62 = vadd.f32 %v2923_v43, %v457_v59  ;;  %v2975_v59 = vpop.permute.xlu0 %1157 }
  0xdf   : > { %v633_v58 = vmax.f32 %v543_v53, 0.0  ;;  %v538_v63 = vadd.f32 %v2923_v43, %v537_v60  ;;  %v2329_v6 = vpop.f32.mrf.mxu0 }
  0xe0   : > { %4500 = vst [vmem:[#allocation31_spill] sm:$0xff] %v2940_v57  ;;  %655 = vst [vmem:[#allocation2 + $0x20] sm:$0xff] %v2940_v57  ;;  %v2353_v9 = vpop.f32.mrf.mxu1  ;;  %v2959_v39 = vmax.f32 %v458_v62, 0.0  ;;  %v473_v44 = vadd.f32 %v2329_v6, %v2923_v43  ;;  %v2969_v51 = vmul.f32 %v2912_v40, %v2940_v57  ;;  %v2973_v52 = vmul.f32 %v2945_v61, %v2940_v57 }
  0xe1   : > { %671 = vst [vmem:[#allocation2 + $0xa0] sm:$0xff] %v633_v58  ;;  %v632_v41 = vmax.f32 %v538_v63, 0.0  ;;  %v553_v46 = vadd.f32 %v2353_v9, %v2923_v43  ;;  %v467_v53 = vpop.f32.mrf.mxu0  ;;  %v2978_v60 = vmul.f32 %v2945_v61, %v633_v58  ;;  %v2981_v47 = vmul.f32 %v2953_v3, %v633_v58 }
  0xe2   : > { %v547_v54 = vpop.f32.mrf.mxu1  ;;  %654 = vst [vmem:[#allocation2 + $0x18] sm:$0xff] %v2959_v39  ;;  %v2984_v55 = vmax.f32 %v473_v44, 0.0  ;;  %v2988_v62 = vmul.f32 %v2912_v40, %v2959_v39  ;;  %v2992_v63 = vmul.f32 %v2945_v61, %v2959_v39  ;;  %v468_v2 = vadd.f32 %v2923_v43, %v467_v53  ;;  %v3068_v21 = vpop.permute.xlu0 %1165 }
  0xe3   : > { %4502 = vst [vmem:[#allocation33_spill] sm:$0xff] %v2978_v60  ;;  %4503 = vst [vmem:[#allocation34_spill] sm:$0xff] %v2981_v47  ;;  %v635_v56 = vmax.f32 %v553_v46, 0.0  ;;  %v2996_v6 = vadd.f32 %v2923_v43, %v547_v54  ;;  %v2332_v58 = vpop.f32.mrf.mxu0 }
  0xe4   : > { %670 = vst [vmem:[#allocation2 + $0x98] sm:$0xff] %v632_v41  ;;  %4504 = vst [vmem:[#allocation35_spill] sm:$0xff] %v2984_v55  ;;  %v2356_v9 = vpop.f32.mrf.mxu1  ;;  %v3001_v41 = vmul.f32 %v2912_v40, %v2984_v55  ;;  %v3005_v44 = vmul.f32 %v2945_v61, %v2984_v55  ;;  %v3009_v46 = vmul.f32 %v2953_v3, %v2984_v55  ;;  %v3012_v54 = vmax.f32 %v468_v2, 0.0 }
  0xe5   : > { %4505 = vst [vmem:[#allocation36_spill] sm:$0xff] %v2996_v6  ;;  %657 = vst [vmem:[#allocation2 + $0x30] sm:$0xff] %v2984_v55  ;;  %v483_v53 = vadd.f32 %v2332_v58, %v2923_v43  ;;  %v3016_v34 = vadd.f32 %v2356_v9, %v2923_v43  ;;  %v477_v33 = vpop.f32.mrf.mxu0  ;;  %v3019_v31 = vmul.f32 %v2945_v61, %v635_v56 }
  0xe6   : > { %673 = vst [vmem:[#allocation2 + $0xb0] sm:$0xff] %v635_v56  ;;  %4506 = vst [vmem:[#allocation37_spill] sm:$0xff] %v3012_v54  ;;  %v557_v32 = vpop.f32.mrf.mxu1  ;;  %v478_v29 = vadd.f32 %v2923_v43, %v477_v33  ;;  %v3028_v2 = vmul.f32 %v2953_v3, %v635_v56  ;;  %v3035_v9 = vmul.f32 %v2912_v40, %v3012_v54  ;;  %v4512_v33 = vmax.f32 %v2996_v6, 0.0 }
  0xe7   : > { %4507 = vst [vmem:[#allocation38_spill] sm:$0xff] %v3016_v34  ;;  %4508 = vst [vmem:[#allocation39_spill] sm:$0xff] %v3019_v31  ;;  %v3021_v30 = vmax.f32 %v483_v53, 0.0  ;;  %v3025_v28 = vadd.f32 %v2923_v43, %v557_v32  ;;  %v3039_v53 = vmul.f32 %v2945_v61, %v3012_v54  ;;  %v3043_v32 = vmul.f32 %v2953_v3, %v3012_v54  ;;  %v2335_v47 = vpop.f32.mrf.mxu0 }
  0xe8   : > { %v1030_v58 = vld [vmem:[#allocation2 + $0xa0] sm:$0xff]  ;;  %4511 = vst [vmem:[#allocation42_spill] sm:$0xff] %v3028_v2  ;;  %656 = vst [vmem:[#allocation2 + $0x28] sm:$0xff] %v3012_v54  ;;  %v3066_v56 = vmax.f32 %v478_v29, 0.0  ;;  %v2359_v60 = vpop.f32.mrf.mxu1  ;;  %v4515_v6 = vmax.f32 %v3016_v34, 0.0  ;;  %v3074_v31 = vadd.f32 %v2335_v47, %v2923_v43 }
  0xe9   : > { %4509 = vst [vmem:[#allocation40_spill] sm:$0xff] %v3021_v30  ;;  %4510 = vst [vmem:[#allocation41_spill] sm:$0xff] %v3025_v28  ;;  %v3056_v2 = vmul.f32 %v2912_v40, %v3021_v30  ;;  %v3060_v27 = vmul.f32 %v2945_v61, %v3021_v30  ;;  %v720_v19 = vld [vmem:[#allocation2 + $0x17] sm:$0xff]  ;;  %v721_v24 = vld [vmem:[#allocation2 + $0x1f] sm:$0xff]  ;;  %v3077_v16 = vadd.f32 %v2359_v60, %v2923_v43 }
  0xea   : > { %672 = vst [vmem:[#allocation2 + $0xa8] sm:$0xff] %v4512_v33  ;;  %659 = vst [vmem:[#allocation2 + $0x40] sm:$0xff] %v3021_v30  ;;  %v3064_v33 = vmul.f32 %v2953_v3, %v3021_v30  ;;  %v1113_v23 = vld [vmem:[#allocation2 + $0x11] sm:$0xff]  ;;  %v3080_v29 = vmul.f32 %v2912_v40, %v1030_v58  ;;  %v912_v17 = vmul.f32 %v2843_v0, %v720_v19  ;;  %v1114_v30 = vld [vmem:[#allocation2 + $0x19] sm:$0xff] }
  0xeb   : > { %4513 = vst [vmem:[#allocation43_spill] sm:$0xff] %v3060_v27  ;;  %675 = vst [vmem:[#allocation2 + $0xc0] sm:$0xff] %v4515_v6  ;;  %v913_v22 = vmul.f32 %v2847_v4, %v721_v24  ;;  %v1273_v55 = vmul.f32 %v2926_v45, %v1113_v23  ;;  %v1405_v6 = vmul.f32 %v2845_v1, %v720_v19  ;;  %v3089_v47 = vld [vmem:[%s4384_s3 + $0x5] ss:$0 sm:$0xff]  ;;  %v4519_v19 = vmax.f32 %v3025_v28, 0.0 }
  0xec   : > { %4514 = vst [vmem:[#allocation44_spill] sm:$0xff] %v3064_v33  ;;  %4516 = vst [vmem:[#allocation45_spill] sm:$0xff] %v3077_v16  ;;  %v3091_v25 = vld [vmem:[#allocation2 + $0x9f] sm:$0xff]  ;;  %v1274_v60 = vmul.f32 %v2957_v37, %v1114_v30  ;;  %v1406_v58 = vmul.f32 %v2849_v5, %v721_v24  ;;  %v949_v34 = vmul.f32 %v2918_v42, %v912_v17  ;;  %v3117_v33 = vpop.permute.xlu0 %1173 }
  0xed   : > { %4517 = vst [vmem:[#allocation46_spill] sm:$0xff] %v3080_v29  ;;  %4518 = vst [vmem:[#allocation47_spill] sm:$0xff] %v3091_v25  ;;  %v1639_v29 = vmul.f32 %v2907_v38, %v1114_v30  ;;  %v1422_v23 = vmul.f32 %v3091_v25, %v2875_v20  ;;  %v950_v14 = vmul.f32 %v2918_v42, %v913_v22 }
  0xee   : > { %658 = vst [vmem:[#allocation2 + $0x38] sm:$0xff] %v3066_v56  ;;  %674 = vst [vmem:[#allocation2 + $0xb8] sm:$0xff] %v4519_v19  ;;  %v1310_v15 = vmul.f32 %v2933_v48, %v1273_v55  ;;  %v1442_v12 = vmul.f32 %v3051_v26, %v1405_v6  ;;  %v1311_v24 = vmul.f32 %v2933_v48, %v1274_v60 }
  0xef   : > { %v1443_v30 = vmul.f32 %v3051_v26, %v1406_v58  ;;  %v1676_v54 = vmul.f32 %v3089_v47, %v1639_v29  ;;  %v3111_v20 = vmul.f32 %v3051_v26, %v1422_v23  ;;  %v1082_v19 = vadd.f32 %v2988_v62, %v949_v34  ;;  %v722_v6 = vld [vmem:[#allocation2 + $0x27] sm:$0xff]  ;;  %v723_v28 = vld [vmem:[#allocation2 + $0x2f] sm:$0xff]  ;;  %4521 = vst [vmem:[#allocation49_spill] sm:$0xff] %v3117_v33 }
  0xf0   : > { %v1083_v17 = vadd.f32 %v2969_v51, %v950_v14  ;;  %v1342_v22 = vadd.f32 %v1310_v15, %v2963_v49  ;;  %v1474_v55 = vadd.f32 %v1442_v12, %v2965_v50  ;;  %v1115_v57 = vld [vmem:[#allocation2 + $0x21] sm:$0xff]  ;;  %v1757_v60 = vmul.f32 %v3091_v25, %v2871_v18  ;;  %v1116_v23 = vld [vmem:[#allocation2 + $0x29] sm:$0xff] }
  0xf1   : > { %4520 = vst [vmem:[#allocation48_spill] sm:$0xff] %v3111_v20  ;;  %v914_v29 = vmul.f32 %v2853_v8, %v722_v6  ;;  %v915_v58 = vmul.f32 %v2851_v7, %v723_v28  ;;  %v1275_v34 = vmul.f32 %v2975_v59, %v1115_v57  ;;  %v3127_v14 = vld [vmem:[%s4384_s3 + $0x6] ss:$0 sm:$0xff]  ;;  %v1343_v12 = vadd.f32 %v1311_v24, %v1082_v19 }
  0xf2   : > { %v1475_v15 = vadd.f32 %v1443_v30, %v1342_v22  ;;  %v1575_v49 = vadd.f32 %v2992_v63, %v1474_v55  ;;  %v1276_v50 = vmul.f32 %v3030_v35, %v1116_v23  ;;  %v3132_v51 = vmul.f32 %v3127_v14, %v1757_v60  ;;  %v3140_v30 = vpop.permute.xlu1 %1177 }
  0xf3   : > { %v951_v62 = vmul.f32 %v2918_v42, %v914_v29  ;;  %v952_v20 = vmul.f32 %v2918_v42, %v915_v58  ;;  %v1312_v18 = vmul.f32 %v2933_v48, %v1275_v34  ;;  %v1407_v27 = vmul.f32 %v2843_v0, %v722_v6  ;;  %v3152_v34 = vld [vmem:[%s4384_s3 + $0x8] ss:$0 sm:$0xff] }
  0xf4   : > { %4522 = vst [vmem:[#allocation50_spill] sm:$0xff] %v3132_v51  ;;  %v1708_v25 = vadd.f32 %v1676_v54, %v1575_v49  ;;  %v1313_v33 = vmul.f32 %v2933_v48, %v1276_v50  ;;  %v1408_v24 = vmul.f32 %v2847_v4, %v723_v28  ;;  %v1576_v55 = vadd.f32 %v2973_v52, %v1475_v15 }
  0xf5   : > { %v1084_v63 = vadd.f32 %v3035_v9, %v951_v62  ;;  %v1085_v19 = vadd.f32 %v3001_v41, %v952_v20  ;;  %v1344_v22 = vadd.f32 %v1312_v18, %v1083_v17  ;;  %v1444_v60 = vmul.f32 %v3051_v26, %v1407_v27  ;;  %v724_v49 = vld [vmem:[#allocation2 + $0x37] sm:$0xff]  ;;  %v3154_v9 = vpop.permute.xlu0 %1181  ;;  %v725_v41 = vld [vmem:[#allocation2 + $0x3f] sm:$0xff] }
  0xf6   : > { %v1445_v29 = vmul.f32 %v3051_v26, %v1408_v24  ;;  %v1640_v54 = vmul.f32 %v2926_v45, %v1115_v57  ;;  %v1641_v58 = vmul.f32 %v2957_v37, %v1116_v23  ;;  %4523 = vst [vmem:[#allocation51_spill] sm:$0xff] %v3154_v9  ;;  %v1742_v18 = vmul.f32 %v2845_v1, %v722_v6  ;;  %v1117_v62 = vld [vmem:[#allocation2 + $0x31] sm:$0xff]  ;;  %v1118_v24 = vld [vmem:[#allocation2 + $0x39] sm:$0xff] }
  0xf7   : > { %v1345_v20 = vadd.f32 %v1313_v33, %v1084_v63  ;;  %v1743_v52 = vmul.f32 %v2849_v5, %v723_v28  ;;  %v1916_v27 = vmul.f32 %v2907_v38, %v1116_v23  ;;  %v1476_v17 = vadd.f32 %v1444_v60, %v1343_v12  ;;  %v3170_v12 = vpop.permute.xlu1 %1185 }
  0xf8   : > { %v1477_v57 = vadd.f32 %v1445_v29, %v1344_v22  ;;  %v1677_v15 = vmul.f32 %v3089_v47, %v1640_v54  ;;  %v1678_v50 = vmul.f32 %v3089_v47, %v1641_v58  ;;  %v1779_v51 = vmul.f32 %v3127_v14, %v1742_v18 }
  0xf9   : > { %v1780_v9 = vmul.f32 %v3127_v14, %v1743_v52  ;;  %v1953_v33 = vmul.f32 %v3152_v34, %v1916_v27  ;;  %v916_v1 = vmul.f32 %v2857_v11, %v724_v49  ;;  %v1577_v5 = vadd.f32 %v3039_v53, %v1476_v17  ;;  %v3179_v18 = vpop.permute.xlu0 %1189  ;;  %v3186_v27 = vld [vmem:[%s4385_s4] ss:$0 sm:$0xff] }
  0xfa   : > { %v1709_v28 = vadd.f32 %v1677_v15, %v1576_v55  ;;  %v917_v38 = vmul.f32 %v2855_v10, %v725_v41  ;;  %v1054_v6 = vmul.f32 %v2912_v40, %v3066_v56  ;;  %v1811_v23 = vadd.f32 %v1779_v51, %v1708_v25  ;;  %4524 = vst [vmem:[#allocation52_spill] sm:$0xff] %v3179_v18 }
  0xfb   : > { %v953_v63 = vmul.f32 %v2918_v42, %v916_v1  ;;  %v1277_v22 = vmul.f32 %v3068_v21, %v1117_v62  ;;  %v1278_v60 = vmul.f32 %v3105_v13, %v1118_v24  ;;  %v1710_v29 = vadd.f32 %v1678_v50, %v1577_v5 }
  0xfc   : > { %v1812_v54 = vadd.f32 %v1780_v9, %v1709_v28  ;;  %v954_v53 = vmul.f32 %v2918_v42, %v917_v38  ;;  %v1409_v55 = vmul.f32 %v2853_v8, %v724_v49  ;;  %v1882_v58 = vadd.f32 %v3043_v32, %v1811_v23 }
  0xfd   : > { %v1086_v25 = vadd.f32 %v1054_v6, %v953_v63  ;;  %v1314_v51 = vmul.f32 %v2933_v48, %v1277_v22  ;;  %v1315_v52 = vmul.f32 %v2933_v48, %v1278_v60  ;;  %v1410_v17 = vmul.f32 %v2851_v7, %v725_v41  ;;  %v3208_v60 = vpop.permute.xlu1 %1193 }
  0xfe   : > { %v3189_v9 = vadd.f32 %v3056_v2, %v954_v53  ;;  %v1446_v15 = vmul.f32 %v3051_v26, %v1409_v55  ;;  %v1547_v32 = vmul.f32 %v2945_v61, %v3066_v56  ;;  %v1985_v50 = vadd.f32 %v1953_v33, %v1882_v58  ;;  %4525 = vst [vmem:[#allocation53_spill] sm:$0xff] %v3208_v60  ;;  %v567_v58 = vpop.f32.mrf.mxu1 }
  0xff   : > { %v1346_v1 = vadd.f32 %v1314_v51, %v1085_v19  ;;  %v3195_v5 = vadd.f32 %v1315_v52, %v1086_v25  ;;  %v1578_v28 = vadd.f32 %v3005_v44, %v1477_v57  ;;  %v1447_v38 = vmul.f32 %v3051_v26, %v1410_v17  ;;  %v487_v44 = vpop.f32.mrf.mxu0 }
 0x100   : > { %v1478_v6 = vadd.f32 %v1446_v15, %v1345_v20  ;;  %v1642_v2 = vmul.f32 %v2975_v59, %v1117_v62  ;;  %v1643_v23 = vmul.f32 %v3030_v35, %v1118_v24  ;;  %v2024_v63 = vadd.f32 %v3186_v27, %v1985_v50 }
 0x101   : > { %v1744_v22 = vmul.f32 %v2843_v0, %v724_v49  ;;  %v1745_v33 = vmul.f32 %v2847_v4, %v725_v41  ;;  %v1852_v19 = vmul.f32 %v2953_v3, %v3066_v56  ;;  %v1479_v57 = vadd.f32 %v1447_v38, %v1346_v1  ;;  %v3215_v49 = vpop.permute.xlu0 %1197 }
 0x102   : > { %v1579_v53 = vadd.f32 %v1547_v32, %v1478_v6  ;;  %v1679_v20 = vmul.f32 %v3089_v47, %v1642_v2  ;;  %v1680_v55 = vmul.f32 %v3089_v47, %v1643_v23  ;;  %v2056_v25 = vmax.f32 %v2024_v63, 0.0  ;;  %4526 = vst [vmem:[#allocation54_spill] sm:$0xff] %v3215_v49  ;;  %v3249_v6 = vpop.permute.xlu1 %1201  ;;  %v4530_v63 = vld [vmem:[#allocation43_spill] sm:$0xff] }
 0x103   : > { %v1781_v51 = vmul.f32 %v3127_v14, %v1744_v22  ;;  %v1782_v0 = vmul.f32 %v3127_v14, %v1745_v33  ;;  %v1883_v4 = vadd.f32 %v3009_v46, %v1812_v54  ;;  %v1917_v17 = vmul.f32 %v2926_v45, %v1117_v62  ;;  %v2338_v46 = vpop.f32.mrf.mxu0  ;;  %4528 = vst [vmem:[#allocation56_spill] sm:$0xff] %v3249_v6  ;;  %v4531_v33 = vld [vmem:[#allocation44_spill] sm:$0xff] }
 0x104   : > { %v1711_v41 = vadd.f32 %v1679_v20, %v1578_v28  ;;  %v3217_v52 = vadd.f32 %v1680_v55, %v1579_v53  ;;  %v1918_v15 = vmul.f32 %v2957_v37, %v1118_v24  ;;  %v2091_v32 = vsel %vm2090_vm2, %v2959_v39, %v2056_v25  ;;  %v2362_v24 = vpop.f32.mrf.mxu1  ;;  %v3264_v25 = vld [vmem:[#allocation2 + $0x99] sm:$0xff] }
 0x105   : > { %v1813_v50 = vadd.f32 %v1781_v51, %v1710_v29  ;;  %v3225_v1 = vmax.f32 %v3074_v31, 0.0  ;;  %v4424_v38 = vmax.f32 %v3077_v16, 0.0  ;;  %2123 = vst [vmem:[%s3228_s15] sm:$0xff] %v2091_v32  ;;  %v1954_v45 = vmul.f32 %v3152_v34, %v1917_v17  ;;  %4533 = vst [vmem:[#allocation44_spill] sm:$0xff] %v3264_v25  ;;  %v3266_v51 = vpop.permute.xlu0 %1205  ;;  %v4545_v16 = vld [vmem:[#allocation37_spill] sm:$0xff] }
 0x106   : > { %v1814_v54 = vadd.f32 %v1782_v0, %v1711_v41  ;;  %v1955_v37 = vmul.f32 %v3152_v34, %v1918_v15  ;;  %v488_v62 = vadd.f32 %v2923_v43, %v487_v44  ;;  %v3254_v22 = vadd.f32 %v4530_v63, %v1479_v57  ;;  %4534 = vst [vmem:[#allocation58_spill] sm:$0xff] %v3266_v51  ;;  %v3268_v0 = vld [vmem:[#allocation2 + $0xa1] sm:$0xff]  ;;  %v577_v15 = vpop.f32.mrf.mxu1 }
 0x107   : > { %4527 = vst [vmem:[#allocation55_spill] sm:$0xff] %v3225_v1  ;;  %v1884_v39 = vadd.f32 %v1852_v19, %v1813_v50  ;;  %661 = vst [vmem:[#allocation2 + $0x50] sm:$0xff] %v3225_v1  ;;  %v3237_v31 = vmul.f32 %v2912_v40, %v3225_v1  ;;  %v3241_v29 = vmul.f32 %v2945_v61, %v3225_v1 }
 0x108   : > { %v3245_v28 = vmul.f32 %v2953_v3, %v3225_v1  ;;  %677 = vst [vmem:[#allocation2 + $0xd0] sm:$0xff] %v4424_v38  ;;  %v1986_v2 = vadd.f32 %v1954_v45, %v1883_v4  ;;  %v3251_v23 = vmax.f32 %v488_v62, 0.0  ;;  %v3257_v19 = vadd.f32 %v4531_v33, %v1814_v54  ;;  %4535 = vst [vmem:[#allocation59_spill] sm:$0xff] %v3268_v0  ;;  %v497_v4 = vpop.f32.mrf.mxu0  ;;  %v4552_v1 = vld [vmem:[#allocation49_spill] sm:$0xff] }
 0x109   : > { %v1987_v44 = vadd.f32 %v1955_v37, %v1884_v39  ;;  %v3260_v53 = vadd.f32 %v2923_v43, %v567_v58  ;;  %v503_v20 = vadd.f32 %v2338_v46, %v2923_v43  ;;  %v583_v55 = vadd.f32 %v2362_v24, %v2923_v43 }
 0x10a   : > { %4529 = vst [vmem:[#allocation57_spill] sm:$0xff] %v3251_v23  ;;  %v2025_v57 = vadd.f32 %v3186_v27, %v1986_v2  ;;  %660 = vst [vmem:[#allocation2 + $0x48] sm:$0xff] %v3251_v23  ;;  %v3274_v41 = vmul.f32 %v2912_v40, %v3251_v23  ;;  %v3278_v58 = vmul.f32 %v2945_v61, %v3251_v23  ;;  %v2341_v38 = vpop.f32.mrf.mxu0 }
 0x10b   : > { %4532 = vst [vmem:[#allocation43_spill] sm:$0xff] %v3260_v53  ;;  %v3282_v17 = vmul.f32 %v2953_v3, %v3251_v23  ;;  %v2026_v32 = vadd.f32 %v3186_v27, %v1987_v44  ;;  %v4425_v50 = vmax.f32 %v3260_v53, 0.0  ;;  %v3286_v46 = vmax.f32 %v503_v20, 0.0  ;;  %v3308_v44 = vpop.permute.xlu1 %1209  ;;  %v4540_v20 = vld [vmem:[#allocation31_spill] sm:$0xff] }
 0x10c   : > { %v641_v54 = vmax.f32 %v583_v55, 0.0  ;;  %v2057_v45 = vmax.f32 %v2025_v57, 0.0  ;;  %v1930_v37 = vmul.f32 %v3264_v25, %v3249_v6  ;;  %v1931_v62 = vmul.f32 %v3268_v0, %v3266_v51  ;;  %4539 = vst [vmem:[#allocation63_spill] sm:$0xff] %v3308_v44  ;;  %v3321_v6 = vld [vmem:[#allocation2 + $0xa9] sm:$0xff] }
 0x10d   : > { %4536 = vst [vmem:[#allocation60_spill] sm:$0xff] %v3286_v46  ;;  %v498_v24 = vadd.f32 %v2923_v43, %v497_v4  ;;  %v2058_v39 = vmax.f32 %v2026_v32, 0.0  ;;  %676 = vst [vmem:[#allocation2 + $0xc8] sm:$0xff] %v4425_v50  ;;  %v3298_v2 = vmul.f32 %v2912_v40, %v3286_v46  ;;  %v3302_v63 = vmul.f32 %v2945_v61, %v3286_v46  ;;  %v2365_v50 = vpop.f32.mrf.mxu1  ;;  %v4551_v51 = vld [vmem:[#allocation6_spill] sm:$0xff] }
 0x10e   : > { %663 = vst [vmem:[#allocation2 + $0x60] sm:$0xff] %v3286_v46  ;;  %v3306_v33 = vmul.f32 %v2953_v3, %v3286_v46  ;;  %679 = vst [vmem:[#allocation2 + $0xe0] sm:$0xff] %v641_v54  ;;  %v2092_v55 = vsel %vm2090_vm2, %v4540_v20, %v2057_v45  ;;  %v3314_v4 = vmul.f32 %v3152_v34, %v1930_v37 }
 0x10f   : > { %4537 = vst [vmem:[#allocation61_spill] sm:$0xff] %v3302_v63  ;;  %v3317_v57 = vmul.f32 %v3152_v34, %v1931_v62  ;;  %v3319_v32 = vmax.f32 %v498_v24, 0.0  ;;  %4544 = vst [vmem:[#allocation66_spill] sm:$0xff] %v3321_v6  ;;  %v2093_v54 = vsel %vm2090_vm2, %v4545_v16, %v2058_v39  ;;  %v578_v46 = vadd.f32 %v2923_v43, %v577_v15 }
 0x110   : > { %4538 = vst [vmem:[#allocation62_spill] sm:$0xff] %v3306_v33  ;;  %4541 = vst [vmem:[#allocation31_spill] sm:$0xff] %v3314_v4  ;;  %v513_v45 = vadd.f32 %v2341_v38, %v2923_v43  ;;  %v593_v37 = vadd.f32 %v2365_v50, %v2923_v43  ;;  %v3346_v38 = vmul.f32 %v3264_v25, %v3308_v44  ;;  %v4550_v4 = vld [vmem:[#allocation7_spill] sm:$0xff] }
 0x111   : > { %4542 = vst [vmem:[#allocation64_spill] sm:$0xff] %v3317_v57  ;;  %4543 = vst [vmem:[#allocation65_spill] sm:$0xff] %v3319_v32  ;;  %v3334_v62 = vmul.f32 %v2912_v40, %v3319_v32  ;;  %v3338_v24 = vmul.f32 %v2945_v61, %v3319_v32  ;;  %v3342_v16 = vmul.f32 %v2953_v3, %v3319_v32  ;;  %v726_v15 = vld [vmem:[#allocation2 + $0x47] sm:$0xff]  ;;  %v727_v50 = vld [vmem:[#allocation2 + $0x4f] sm:$0xff]  ;;  %v640_v20 = vmax.f32 %v578_v46, 0.0 }
 0x112   : > { %2124 = vst [vmem:[%s3228_s15 + $0x8] sm:$0xff] %v2092_v55  ;;  %2125 = vst [vmem:[%s3228_s15 + $0x10] sm:$0xff] %v2093_v54  ;;  %v1119_v39 = vld [vmem:[#allocation2 + $0x41] sm:$0xff]  ;;  %v3348_v55 = vmax.f32 %v513_v45, 0.0  ;;  %v643_v54 = vmax.f32 %v593_v37, 0.0  ;;  %v3352_v57 = vmul.f32 %v3321_v6, %v3308_v44  ;;  %v918_v53 = vmul.f32 %v4550_v4, %v726_v15 }
 0x113   : > { %662 = vst [vmem:[#allocation2 + $0x58] sm:$0xff] %v3319_v32  ;;  %4546 = vst [vmem:[#allocation37_spill] sm:$0xff] %v3342_v16  ;;  %v919_v49 = vmul.f32 %v4551_v51, %v727_v50  ;;  %v1120_v32 = vld [vmem:[#allocation2 + $0x49] sm:$0xff]  ;;  %v1279_v60 = vmul.f32 %v4552_v1, %v1119_v39  ;;  %v1411_v18 = vmul.f32 %v2857_v11, %v726_v15 }
 0x114   : > { %4547 = vst [vmem:[#allocation67_spill] sm:$0xff] %v3346_v38  ;;  %4548 = vst [vmem:[#allocation68_spill] sm:$0xff] %v3348_v55  ;;  %v1280_v23 = vmul.f32 %v3140_v30, %v1120_v32  ;;  %v1412_v46 = vmul.f32 %v2855_v10, %v727_v50  ;;  %v1644_v45 = vmul.f32 %v3068_v21, %v1119_v39 }
 0x115   : > { %4549 = vst [vmem:[#allocation69_spill] sm:$0xff] %v3352_v57  ;;  %v1645_v37 = vmul.f32 %v3105_v13, %v1120_v32  ;;  %678 = vst [vmem:[#allocation2 + $0xd8] sm:$0xff] %v640_v20  ;;  %v955_v44 = vmul.f32 %v2918_v42, %v918_v53  ;;  %v956_v6 = vmul.f32 %v2918_v42, %v919_v49 }
 0x116   : > { %665 = vst [vmem:[#allocation2 + $0x70] sm:$0xff] %v3348_v55  ;;  %681 = vst [vmem:[#allocation2 + $0xf0] sm:$0xff] %v643_v54  ;;  %v1316_v25 = vmul.f32 %v2933_v48, %v1279_v60  ;;  %v1448_v33 = vmul.f32 %v3051_v26, %v1411_v18  ;;  %v1317_v63 = vmul.f32 %v2933_v48, %v1280_v23 }
 0x117   : > { %v1449_v43 = vmul.f32 %v3051_v26, %v1412_v46  ;;  %v1681_v0 = vmul.f32 %v3089_v47, %v1644_v45  ;;  %v1682_v57 = vmul.f32 %v3089_v47, %v1645_v37  ;;  %v1088_v20 = vadd.f32 %v3274_v41, %v955_v44 }
 0x118   : > { %v1089_v54 = vadd.f32 %v3237_v31, %v956_v6  ;;  %v1348_v53 = vadd.f32 %v1316_v25, %v3189_v9  ;;  %v1480_v49 = vadd.f32 %v1448_v33, %v3195_v5  ;;  %v1746_v18 = vmul.f32 %v2853_v8, %v726_v15  ;;  %v4553_v8 = vld [vmem:[#allocation9_spill] sm:$0xff] }
 0x119   : > { %v1713_v60 = vadd.f32 %v1681_v0, %v3254_v22  ;;  %v1747_v23 = vmul.f32 %v2851_v7, %v727_v50  ;;  %v1919_v46 = vmul.f32 %v2975_v59, %v1119_v39  ;;  %v1349_v37 = vadd.f32 %v1317_v63, %v1088_v20  ;;  %v4554_v0 = vld [vmem:[#allocation8_spill] sm:$0xff]  ;;  %v4555_v63 = vld [vmem:[#allocation51_spill] sm:$0xff] }
 0x11a   : > { %v728_v38 = vld [vmem:[#allocation2 + $0x57] sm:$0xff]  ;;  %v729_v45 = vld [vmem:[#allocation2 + $0x5f] sm:$0xff]  ;;  %v1481_v3 = vadd.f32 %v1449_v43, %v1348_v53  ;;  %v1581_v41 = vadd.f32 %v3278_v58, %v1480_v49  ;;  %v1920_v31 = vmul.f32 %v3030_v35, %v1120_v32  ;;  %v1783_v9 = vmul.f32 %v3127_v14, %v1746_v18 }
 0x11b   : > { %v1121_v16 = vld [vmem:[#allocation2 + $0x51] sm:$0xff]  ;;  %v1784_v5 = vmul.f32 %v3127_v14, %v1747_v23  ;;  %v1956_v6 = vmul.f32 %v3152_v34, %v1919_v46  ;;  %v920_v22 = vmul.f32 %v4553_v8, %v728_v38  ;;  %v1122_v7 = vld [vmem:[#allocation2 + $0x59] sm:$0xff]  ;;  %v921_v33 = vmul.f32 %v4554_v0, %v729_v45 }
 0x11c   : > { %v1714_v25 = vadd.f32 %v1682_v57, %v1581_v41  ;;  %v1957_v59 = vmul.f32 %v3152_v34, %v1920_v31  ;;  %v1281_v43 = vmul.f32 %v4555_v63, %v1121_v16  ;;  %v1815_v58 = vadd.f32 %v1783_v9, %v3217_v52 }
 0x11d   : > { %v1816_v44 = vadd.f32 %v1784_v5, %v1713_v60  ;;  %v1988_v35 = vadd.f32 %v1956_v6, %v3257_v19  ;;  %v957_v32 = vmul.f32 %v2918_v42, %v920_v22  ;;  %v958_v15 = vmul.f32 %v2918_v42, %v921_v33  ;;  %v4556_v22 = vld [vmem:[#allocation35_spill] sm:$0xff] }
 0x11e   : > { %v1282_v50 = vmul.f32 %v3170_v12, %v1122_v7  ;;  %v1318_v39 = vmul.f32 %v2933_v48, %v1281_v43  ;;  %v1413_v57 = vmul.f32 %v4550_v4, %v728_v38  ;;  %v1886_v20 = vadd.f32 %v3282_v17, %v1815_v58 }
 0x11f   : > { %v2027_v53 = vadd.f32 %v3186_v27, %v1988_v35  ;;  %v1090_v49 = vadd.f32 %v3334_v62, %v957_v32  ;;  %v1414_v52 = vmul.f32 %v4551_v51, %v729_v45  ;;  %v3400_v19 = vadd.f32 %v3298_v2, %v958_v15 }
 0x120   : > { %v1319_v60 = vmul.f32 %v2933_v48, %v1282_v50  ;;  %v1350_v18 = vadd.f32 %v1318_v39, %v1089_v54  ;;  %v1450_v23 = vmul.f32 %v3051_v26, %v1413_v57  ;;  %v1989_v46 = vadd.f32 %v1957_v59, %v1886_v20  ;;  %v587_v20 = vpop.f32.mrf.mxu1 }
 0x121   : > { %v2059_v41 = vmax.f32 %v2027_v53, 0.0  ;;  %v1451_v31 = vmul.f32 %v3051_v26, %v1414_v52  ;;  %v1582_v17 = vadd.f32 %v3241_v29, %v1481_v3  ;;  %v1646_v5 = vmul.f32 %v4552_v1, %v1121_v16  ;;  %v4560_v53 = vld [vmem:[#allocation37_spill] sm:$0xff] }
 0x122   : > { %v3406_v9 = vadd.f32 %v1319_v60, %v1090_v49  ;;  %v1482_v62 = vadd.f32 %v1450_v23, %v1349_v37  ;;  %v1647_v2 = vmul.f32 %v3140_v30, %v1122_v7  ;;  %v2028_v6 = vadd.f32 %v3186_v27, %v1989_v46  ;;  %v4561_v60 = vld [vmem:[#allocation67_spill] sm:$0xff]  ;;  %v4563_v23 = vld [vmem:[#allocation69_spill] sm:$0xff] }
 0x123   : > { %v2094_v54 = vsel %vm2090_vm2, %v4556_v22, %v2059_v41  ;;  %v1483_v33 = vadd.f32 %v1451_v31, %v1350_v18  ;;  %v1748_v59 = vmul.f32 %v2857_v11, %v728_v38  ;;  %v1683_v3 = vmul.f32 %v3089_v47, %v1646_v5  ;;  %v4565_v41 = vld [vmem:[#allocation59_spill] sm:$0xff] }
 0x124   : > { %2126 = vst [vmem:[%s3228_s15 + $0x18] sm:$0xff] %v2094_v54  ;;  %v1583_v43 = vadd.f32 %v3338_v24, %v1482_v62  ;;  %v1684_v29 = vmul.f32 %v3089_v47, %v1647_v2  ;;  %v1749_v37 = vmul.f32 %v2855_v10, %v729_v45  ;;  %v2060_v58 = vmax.f32 %v2028_v6, 0.0  ;;  %v4566_v62 = vld [vmem:[#allocation30_spill] sm:$0xff]  ;;  %v4567_v2 = vld [vmem:[#allocation61_spill] sm:$0xff] }
 0x125   : > { %v1785_v35 = vmul.f32 %v3127_v14, %v1748_v59  ;;  %v1887_v32 = vadd.f32 %v3245_v28, %v1816_v44  ;;  %v1921_v15 = vmul.f32 %v3068_v21, %v1121_v16  ;;  %v1715_v50 = vadd.f32 %v1683_v3, %v1582_v17  ;;  %v3435_v28 = vpop.permute.xlu0 %1213  ;;  %v3437_v21 = vld [vmem:[#allocation2 + $0xb1] sm:$0xff]  ;;  %v507_v16 = vpop.f32.mrf.mxu0 }
 0x126   : > { %v3423_v39 = vadd.f32 %v1684_v29, %v1583_v43  ;;  %v1786_v11 = vmul.f32 %v3127_v14, %v1749_v37  ;;  %v1922_v24 = vmul.f32 %v3105_v13, %v1122_v7  ;;  %v2095_v38 = vsel %vm2090_vm2, %v3066_v56, %v2060_v58  ;;  %4557 = vst [vmem:[#allocation7_spill] sm:$0xff] %v3435_v28  ;;  %v4559_v56 = vld [vmem:[#allocation32_spill] sm:$0xff]  ;;  %v4568_v59 = vld [vmem:[#allocation62_spill] sm:$0xff] }
 0x127   : > { %v1817_v10 = vadd.f32 %v1785_v35, %v1714_v25  ;;  %v1958_v45 = vmul.f32 %v3152_v34, %v1921_v15  ;;  %v3433_v57 = vmul.f32 %v2912_v40, %v3348_v55  ;;  %4558 = vst [vmem:[#allocation6_spill] sm:$0xff] %v3437_v21  ;;  %2127 = vst [vmem:[%s3228_s15 + $0x20] sm:$0xff] %v2095_v38  ;;  %v2344_v29 = vpop.f32.mrf.mxu0  ;;  %v1218_v15 = vpop.permute.xlu1 %1217 }
 0x128   : > { %v1818_v44 = vadd.f32 %v1786_v11, %v1715_v50  ;;  %v1959_v13 = vmul.f32 %v3152_v34, %v1922_v24  ;;  %v3443_v7 = vmul.f32 %v2945_v61, %v3348_v55  ;;  %v3447_v25 = vmul.f32 %v4559_v56, %v3348_v55 }
 0x129   : > { %v1888_v49 = vadd.f32 %v4560_v53, %v1817_v10  ;;  %v1990_v52 = vadd.f32 %v1958_v45, %v1887_v32  ;;  %v3452_v18 = vmul.f32 %v3089_v47, %v4561_v60  ;;  %v3456_v46 = vmul.f32 %v3152_v34, %v4563_v23  ;;  %v2368_v32 = vpop.f32.mrf.mxu1  ;;  %v4575_v53 = vld [vmem:[#allocation40_spill] sm:$0xff] }
 0x12a   : > { %v1656_v31 = vmul.f32 %v4565_v41, %v3435_v28  ;;  %v1933_v17 = vmul.f32 %v3437_v21, %v3435_v28  ;;  %v508_v5 = vadd.f32 %v4566_v62, %v507_v16  ;;  %v3464_v6 = vadd.f32 %v4567_v2, %v1483_v33  ;;  %v4576_v60 = vld [vmem:[#allocation44_spill] sm:$0xff] }
 0x12b   : > { %4562 = vst [vmem:[#allocation49_spill] sm:$0xff] %v3452_v18  ;;  %4564 = vst [vmem:[#allocation9_spill] sm:$0xff] %v3456_v46  ;;  %v1991_v22 = vadd.f32 %v1959_v13, %v1888_v49  ;;  %v2029_v54 = vadd.f32 %v3186_v27, %v1990_v52  ;;  %v3468_v43 = vadd.f32 %v4568_v59, %v1818_v44  ;;  %v3499_v13 = vld [vmem:[#allocation2 + $0xb9] sm:$0xff]  ;;  %v4592_v46 = vld [vmem:[#allocation46_spill] sm:$0xff] }
 0x12c   : > { %v588_v3 = vadd.f32 %v4566_v62, %v587_v20  ;;  %v3472_v37 = vmul.f32 %v3089_v47, %v1656_v31  ;;  %v3475_v58 = vmul.f32 %v3152_v34, %v1933_v17  ;;  %v3477_v35 = vmax.f32 %v508_v5, 0.0  ;;  %4574 = vst [vmem:[#allocation67_spill] sm:$0xff] %v3499_v13  ;;  %v1222_v31 = vpop.permute.xlu0 %1221  ;;  %v3506_v17 = vld [vmem:[#allocation2 + $0xaf] sm:$0xff] }
 0x12d   : > { %v523_v33 = vadd.f32 %v2344_v29, %v4566_v62  ;;  %v2030_v50 = vadd.f32 %v3186_v27, %v1991_v22  ;;  %v2061_v11 = vmax.f32 %v2029_v54, 0.0  ;;  %v603_v38 = vadd.f32 %v2368_v32, %v4566_v62  ;;  %4577 = vst [vmem:[#allocation69_spill] sm:$0xff] %v3506_v17  ;;  %v4580_v54 = vld [vmem:[#allocation66_spill] sm:$0xff]  ;;  %v4582_v29 = vld [vmem:[#allocation57_spill] sm:$0xff] }
 0x12e   : > { %4569 = vst [vmem:[#allocation8_spill] sm:$0xff] %v3472_v37  ;;  %4570 = vst [vmem:[#allocation51_spill] sm:$0xff] %v3475_v58  ;;  %v3481_v24 = vmax.f32 %v588_v3, 0.0  ;;  %v3487_v10 = vmul.f32 %v2912_v40, %v3477_v35  ;;  %v3491_v45 = vmul.f32 %v2945_v61, %v3477_v35  ;;  %v3495_v16 = vmul.f32 %v4559_v56, %v3477_v35  ;;  %v3523_v3 = vld [vmem:[#allocation2 + $0xbf] sm:$0xff] }
 0x12f   : > { %4571 = vst [vmem:[#allocation35_spill] sm:$0xff] %v3477_v35  ;;  %664 = vst [vmem:[#allocation2 + $0x68] sm:$0xff] %v3477_v35  ;;  %v3497_v44 = vmax.f32 %v523_v33, 0.0  ;;  %v2062_v20 = vmax.f32 %v2030_v50, 0.0  ;;  %v2096_v49 = vsel %vm2090_vm2, %v4575_v53, %v2061_v11  ;;  %v645_v52 = vmax.f32 %v603_v38, 0.0  ;;  %v4585_v50 = vld [vmem:[#allocation47_spill] sm:$0xff] }
 0x130   : > { %4572 = vst [vmem:[#allocation32_spill] sm:$0xff] %v3481_v24  ;;  %680 = vst [vmem:[#allocation2 + $0xe8] sm:$0xff] %v3481_v24  ;;  %v1290_v23 = vmul.f32 %v4576_v60, %v1218_v15  ;;  %v1657_v59 = vmul.f32 %v4580_v54, %v1218_v15  ;;  %v1934_v32 = vmul.f32 %v3499_v13, %v1218_v15  ;;  %v3541_v60 = vld [vmem:[#allocation2 + $0xc1] sm:$0xff]  ;;  %v4590_v24 = vld [vmem:[#allocation38_spill] sm:$0xff] }
 0x131   : > { %4573 = vst [vmem:[#allocation37_spill] sm:$0xff] %v3497_v44  ;;  %2128 = vst [vmem:[%s3228_s15 + $0x28] sm:$0xff] %v2096_v49  ;;  %v3512_v5 = vmul.f32 %v2912_v40, %v3497_v44  ;;  %v3516_v2 = vmul.f32 %v2945_v61, %v3497_v44  ;;  %v3520_v22 = vmul.f32 %v4559_v56, %v3497_v44  ;;  %v4584_v61 = vld [vmem:[#allocation16_spill] sm:$0xff] }
 0x132   : > { %667 = vst [vmem:[#allocation2 + $0x80] sm:$0xff] %v3497_v44  ;;  %4581 = vst [vmem:[#allocation61_spill] sm:$0xff] %v3523_v3  ;;  %v2097_v33 = vsel %vm2090_vm2, %v4582_v29, %v2062_v20  ;;  %v3529_v40 = vmul.f32 %v2933_v48, %v1290_v23  ;;  %v929_v11 = vmul.f32 %v4585_v50, %v4584_v61  ;;  %v4589_v23 = vld [vmem:[#allocation14_spill] sm:$0xff]  ;;  %v4591_v44 = vmax.f32 %v4590_v24, 0.0 }
 0x133   : > { %4578 = vst [vmem:[#allocation59_spill] sm:$0xff] %v3516_v2  ;;  %4579 = vst [vmem:[#allocation30_spill] sm:$0xff] %v3520_v22  ;;  %v3536_v38 = vmul.f32 %v3089_v47, %v1657_v59  ;;  %v1291_v53 = vmul.f32 %v4565_v41, %v1222_v31  ;;  %v1424_v49 = vmul.f32 %v3506_v17, %v4584_v61 }
 0x134   : > { %683 = vst [vmem:[#allocation2 + $0x100] sm:$0xff] %v645_v52  ;;  %4583 = vst [vmem:[#allocation62_spill] sm:$0xff] %v3529_v40  ;;  %v1658_v20 = vmul.f32 %v3437_v21, %v1222_v31  ;;  %v3545_v52 = vmul.f32 %v3152_v34, %v1934_v32  ;;  %v966_v15 = vmul.f32 %v2918_v42, %v929_v11 }
 0x135   : > { %2129 = vst [vmem:[%s3228_s15 + $0x30] sm:$0xff] %v2097_v33  ;;  %4586 = vst [vmem:[#allocation40_spill] sm:$0xff] %v3536_v38  ;;  %v1759_v29 = vmul.f32 %v3506_v17, %v4589_v23  ;;  %v1761_v59 = vmul.f32 %v3523_v3, %v4584_v61  ;;  %v1328_v41 = vmul.f32 %v2933_v48, %v1291_v53  ;;  %v4595_v23 = vld [vmem:[#allocation10_spill] sm:$0xff]  ;;  %v4597_v38 = vld [vmem:[#allocation53_spill] sm:$0xff]  ;;  %v517_v17 = vpop.f32.mrf.mxu0 }
 0x136   : > { %4587 = vst [vmem:[#allocation44_spill] sm:$0xff] %v3541_v60  ;;  %4588 = vst [vmem:[#allocation66_spill] sm:$0xff] %v3545_v52  ;;  %v1461_v33 = vmul.f32 %v3051_v26, %v1424_v49  ;;  %v3555_v50 = vmul.f32 %v3089_v47, %v1658_v20  ;;  %v3560_v32 = vmul.f32 %v4559_v56, %v4591_v44  ;;  %v730_v55 = vld [vmem:[#allocation2 + $0x67] sm:$0xff]  ;;  %v731_v11 = vld [vmem:[#allocation2 + $0x6f] sm:$0xff] }
 0x137   : > { %v1123_v58 = vld [vmem:[#allocation2 + $0x61] sm:$0xff]  ;;  %v1099_v37 = vadd.f32 %v4592_v46, %v966_v15  ;;  %v3564_v18 = vmul.f32 %v3127_v14, %v1759_v29  ;;  %v3567_v61 = vmul.f32 %v3127_v14, %v1761_v59  ;;  %v1935_v53 = vmul.f32 %v3541_v60, %v1222_v31  ;;  %v4594_v49 = vld [vmem:[#allocation11_spill] sm:$0xff]  ;;  %v1124_v22 = vld [vmem:[#allocation2 + $0x69] sm:$0xff] }
 0x138   : > { %v922_v20 = vmul.f32 %v4594_v49, %v730_v55  ;;  %v923_v24 = vmul.f32 %v4595_v23, %v731_v11  ;;  %v4596_v44 = vld [vmem:[#allocation52_spill] sm:$0xff]  ;;  %v1415_v52 = vmul.f32 %v4553_v8, %v730_v55  ;;  %v1284_v3 = vmul.f32 %v4597_v38, %v1124_v22 }
 0x139   : > { %4593 = vst [vmem:[#allocation57_spill] sm:$0xff] %v3564_v18  ;;  %v1283_v2 = vmul.f32 %v4596_v44, %v1123_v58  ;;  %v1416_v46 = vmul.f32 %v4554_v0, %v731_v11  ;;  %v1648_v15 = vmul.f32 %v4555_v63, %v1123_v58  ;;  %v1649_v29 = vmul.f32 %v3170_v12, %v1124_v22 }
 0x13a   : > { %v959_v59 = vmul.f32 %v2918_v42, %v922_v20  ;;  %v960_v31 = vmul.f32 %v2918_v42, %v923_v24  ;;  %v1452_v60 = vmul.f32 %v3051_v26, %v1415_v52  ;;  %v3583_v35 = vmul.f32 %v2933_v48, %v1284_v3  ;;  %v597_v52 = vpop.f32.mrf.mxu1 }
 0x13b   : > { %v1320_v18 = vmul.f32 %v2933_v48, %v1283_v2  ;;  %v1453_v21 = vmul.f32 %v3051_v26, %v1416_v46  ;;  %v1685_v38 = vmul.f32 %v3089_v47, %v1648_v15  ;;  %v1686_v40 = vmul.f32 %v3089_v47, %v1649_v29 }
 0x13c   : > { %v3589_v28 = vadd.f32 %v3487_v10, %v959_v59  ;;  %v3592_v20 = vadd.f32 %v3433_v57, %v960_v31  ;;  %v1484_v2 = vadd.f32 %v1452_v60, %v3406_v9  ;;  %v1750_v3 = vmul.f32 %v4550_v4, %v730_v55 }
 0x13d   : > { %v1352_v42 = vadd.f32 %v1320_v18, %v3400_v19  ;;  %v1717_v48 = vadd.f32 %v1685_v38, %v3464_v6  ;;  %v1751_v24 = vmul.f32 %v4551_v51, %v731_v11  ;;  %v1923_v46 = vmul.f32 %v4552_v1, %v1123_v58  ;;  %v2347_v6 = vpop.f32.mrf.mxu0 }
 0x13e   : > { %v1585_v10 = vadd.f32 %v3491_v45, %v1484_v2  ;;  %v1924_v29 = vmul.f32 %v3140_v30, %v1124_v22  ;;  %v1360_v57 = vadd.f32 %v1328_v41, %v1099_v37  ;;  %v1787_v59 = vmul.f32 %v3127_v14, %v1750_v3  ;;  %v4598_v22 = vld [vmem:[#allocation39_spill] sm:$0xff] }
 0x13f   : > { %v1485_v15 = vadd.f32 %v1453_v21, %v1352_v42  ;;  %v1788_v19 = vmul.f32 %v3127_v14, %v1751_v24  ;;  %v1960_v9 = vmul.f32 %v3152_v34, %v1923_v46  ;;  %v1972_v18 = vmul.f32 %v3152_v34, %v1935_v53  ;;  %v2371_v21 = vpop.f32.mrf.mxu1  ;;  %v4601_v3 = vld [vmem:[#allocation19_spill] sm:$0xff] }
 0x140   : > { %v3606_v4 = vadd.f32 %v1686_v40, %v1585_v10  ;;  %v1961_v51 = vmul.f32 %v3152_v34, %v1924_v29  ;;  %v1493_v1 = vadd.f32 %v1461_v33, %v1360_v57  ;;  %v518_v55 = vadd.f32 %v4566_v62, %v517_v17  ;;  %v3621_v40 = vld [vmem:[%s4383_s2] ss:$0 sm:$0xff]  ;;  %v3673_v10 = vld [vmem:[%s4384_s3 + $0x7] ss:$0 sm:$0xff]  ;;  %v3679_v57 = vld [vmem:[#allocation2 + $0xb7] sm:$0xff] }
 0x141   : > { %v1819_v30 = vadd.f32 %v1787_v59, %v3423_v39  ;;  %v1820_v37 = vadd.f32 %v1788_v19, %v1717_v48  ;;  %v1992_v58 = vadd.f32 %v1960_v9, %v3468_v43  ;;  %v3613_v45 = vadd.f32 %v3443_v7, %v1485_v15  ;;  %v3625_v39 = vld [vmem:[#allocation2 + $0xa7] sm:$0xff]  ;;  %v3645_v48 = vpop.permute.xlu1 %1225  ;;  %v3664_v15 = vld [vmem:[%s4384_s3 + $0x4] ss:$0 sm:$0xff]  ;;  %4604 = vst [vmem:[#allocation39_spill] sm:$0xff] %v3679_v57  ;;  %v4605_v9 = vld [vmem:[#allocation55_spill] sm:$0xff] }
 0x142   : > { %v1594_v38 = vadd.f32 %v4598_v22, %v1493_v1  ;;  %v3616_v60 = vmax.f32 %v518_v55, 0.0  ;;  %v598_v62 = vadd.f32 %v3621_v40, %v597_v52  ;;  %v533_v17 = vadd.f32 %v3621_v40, %v2347_v6  ;;  %v3681_v59 = vld [vmem:[#allocation2 + $0xa8] sm:$0xff] }
 0x143   : > { %v1890_v43 = vadd.f32 %v3495_v16, %v1819_v30  ;;  %v2031_v7 = vadd.f32 %v3186_v27, %v1992_v58  ;;  %v3630_v41 = vadd.f32 %v3447_v25, %v1820_v37  ;;  %v613_v33 = vadd.f32 %v3621_v40, %v2371_v21  ;;  %v3643_v16 = vld [vmem:[#allocation2 + $0x98] sm:$0xff]  ;;  %v4606_v30 = vld [vmem:[#allocation36_spill] sm:$0xff] }
 0x144   : > { %v1727_v11 = vadd.f32 %v3555_v50, %v1594_v38  ;;  %666 = vst [vmem:[#allocation2 + $0x78] sm:$0xff] %v3616_v60  ;;  %v3637_v53 = vmul.f32 %v4559_v56, %v3616_v60  ;;  %v3639_v31 = vmax.f32 %v598_v62, 0.0  ;;  %v3641_v42 = vmax.f32 %v533_v17, 0.0  ;;  %v3655_v56 = vld [vmem:[%s4384_s3 + $0x1] ss:$0 sm:$0xff]  ;;  %v4608_v38 = vld [vmem:[#allocation17_spill] sm:$0xff] }
 0x145   : > { %v1993_v2 = vadd.f32 %v1961_v51, %v1890_v43  ;;  %v2063_v52 = vmax.f32 %v2031_v7, 0.0  ;;  %v647_v25 = vmax.f32 %v613_v33, 0.0  ;;  %v930_v50 = vmul.f32 %v4601_v3, %v3625_v39  ;;  %v3690_v51 = vld [vmem:[%s4384_s3] ss:$0 sm:$0xff] }
 0x146   : > { %4599 = vst [vmem:[#allocation16_spill] sm:$0xff] %v3639_v31  ;;  %4600 = vst [vmem:[#allocation47_spill] sm:$0xff] %v3641_v42  ;;  %v1830_v24 = vadd.f32 %v3567_v61, %v1727_v11  ;;  %v3659_v46 = vmul.f32 %v3655_v56, %v3641_v42  ;;  %v3668_v61 = vmul.f32 %v3664_v15, %v3641_v42  ;;  %v4607_v37 = vmax.f32 %v4606_v30, 0.0 }
 0x147   : > { %682 = vst [vmem:[#allocation2 + $0xf8] sm:$0xff] %v3639_v31  ;;  %669 = vst [vmem:[#allocation2 + $0x90] sm:$0xff] %v3641_v42  ;;  %v3677_v29 = vmul.f32 %v3673_v10, %v3641_v42  ;;  %v2032_v19 = vadd.f32 %v3186_v27, %v1993_v2  ;;  %v2098_v6 = vsel %vm2090_vm2, %v4605_v9, %v2063_v52 }
 0x148   : > { %4602 = vst [vmem:[#allocation38_spill] sm:$0xff] %v3668_v61  ;;  %685 = vst [vmem:[#allocation2 + $0x110] sm:$0xff] %v647_v25  ;;  %v967_v1 = vmul.f32 %v3690_v51, %v930_v50  ;;  %v3695_v55 = vmul.f32 %v3655_v56, %v3643_v16  ;;  %v1901_v21 = vadd.f32 %v3560_v32, %v1830_v24  ;;  %v4609_v32 = vld [vmem:[#allocation41_spill] sm:$0xff] }
 0x149   : > { %4603 = vst [vmem:[#allocation46_spill] sm:$0xff] %v3677_v29  ;;  %2130 = vst [vmem:[%s3228_s15 + $0x38] sm:$0xff] %v2098_v6  ;;  %v1068_v58 = vmul.f32 %v3655_v56, %v4607_v37  ;;  %v1292_v22 = vmul.f32 %v4580_v54, %v3645_v48  ;;  %v1423_v62 = vmul.f32 %v4608_v38, %v3625_v39  ;;  %v2064_v17 = vmax.f32 %v2032_v19, 0.0  ;;  %v3720_v54 = vld [vmem:[%s4384_s3 + $0x2] ss:$0 sm:$0xff]  ;;  %v4611_v24 = vld [vmem:[#allocation65_spill] sm:$0xff] }
 0x14a   : > { %v1425_v43 = vmul.f32 %v3679_v57, %v4601_v3  ;;  %v3710_v7 = vmul.f32 %v3664_v15, %v3681_v59  ;;  %v4610_v33 = vmax.f32 %v4609_v32, 0.0  ;;  %v2004_v2 = vadd.f32 %v1972_v18, %v1901_v21 }
 0x14b   : > { %v1100_v52 = vadd.f32 %v1068_v58, %v967_v1  ;;  %v1329_v25 = vmul.f32 %v3720_v54, %v1292_v22  ;;  %v3724_v50 = vmul.f32 %v3051_v26, %v1423_v62  ;;  %v2099_v19 = vsel %vm2090_vm2, %v4611_v24, %v2064_v17  ;;  %v733_v9 = vld [vmem:[#allocation2 + $0x7f] sm:$0xff]  ;;  %v1125_v6 = vld [vmem:[#allocation2 + $0x71] sm:$0xff] }
 0x14c   : > { %v3715_v11 = vmul.f32 %v3664_v15, %v4610_v33  ;;  %v3729_v30 = vld [vmem:[#allocation2 + $0x77] sm:$0xff]  ;;  %v1462_v18 = vmul.f32 %v3051_v26, %v1425_v43  ;;  %v1659_v1 = vmul.f32 %v3499_v13, %v3645_v48  ;;  %v1760_v21 = vmul.f32 %v3679_v57, %v4608_v38  ;;  %2131 = vst [vmem:[%s3228_s15 + $0x40] sm:$0xff] %v2099_v19  ;;  %v4612_v58 = vld [vmem:[#allocation12_spill] sm:$0xff] }
 0x14d   : > { %v2043_v37 = vadd.f32 %v3186_v27, %v2004_v2  ;;  %v925_v22 = vmul.f32 %v4612_v58, %v733_v9  ;;  %v4613_v62 = vld [vmem:[#allocation54_spill] sm:$0xff]  ;;  %v3742_v17 = vmul.f32 %v3729_v30, %v4594_v49  ;;  %v1418_v33 = vmul.f32 %v4595_v23, %v733_v9  ;;  %v3745_v43 = vld [vmem:[#allocation2 + $0x79] sm:$0xff] }
 0x14e   : > { %v1285_v32 = vmul.f32 %v4613_v62, %v1125_v6  ;;  %v1650_v24 = vmul.f32 %v4596_v44, %v1125_v6  ;;  %v1752_v31 = vmul.f32 %v3729_v30, %v4553_v8  ;;  %v1753_v2 = vmul.f32 %v4554_v0, %v733_v9  ;;  %v1129_v29 = vld [vmem:[#allocation2 + $0x91] sm:$0xff] }
 0x14f   : > { %v2075_v19 = vmax.f32 %v2043_v37, 0.0  ;;  %v962_v42 = vmul.f32 %v3690_v51, %v925_v22  ;;  %v1925_v57 = vmul.f32 %v4555_v63, %v1125_v6  ;;  %v1455_v23 = vmul.f32 %v3051_v26, %v1418_v33  ;;  %v2428_v8 = vld [vmem:[#allocation2 + $0xb0] sm:$0xff]  ;;  %v4614_v22 = vld [vmem:[#allocation7_spill] sm:$0xff] }
 0x150   : > { %v1322_v13 = vmul.f32 %v3720_v54, %v1285_v32  ;;  %v1687_v61 = vmul.f32 %v3089_v47, %v1650_v24  ;;  %v1789_v44 = vmul.f32 %v3127_v14, %v1752_v31  ;;  %v1790_v49 = vmul.f32 %v3127_v14, %v1753_v2  ;;  %v3771_v33 = vld [vmem:[#allocation2 + $0x97] sm:$0xff] }
 0x151   : > { %v2110_v0 = vsel %vm2090_vm2, %v2428_v8, %v2075_v19  ;;  %v3761_v9 = vadd.f32 %v3512_v5, %v962_v42  ;;  %v1926_v63 = vmul.f32 %v3745_v43, %v3170_v12  ;;  %v1962_v31 = vmul.f32 %v3152_v34, %v1925_v57  ;;  %v4615_v42 = vld [vmem:[#allocation58_spill] sm:$0xff]  ;;  %v3778_v12 = vld [vmem:[#allocation2 + $0xc7] sm:$0xff] }
 0x152   : > { %v1354_v37 = vadd.f32 %v1322_v13, %v3592_v20  ;;  %2142 = vst [vmem:[%s3228_s15 + $0x98] sm:$0xff] %v2110_v0  ;;  %v1719_v26 = vadd.f32 %v1687_v61, %v3613_v45  ;;  %v1821_v6 = vadd.f32 %v1789_v44, %v3606_v4  ;;  %v1289_v32 = vmul.f32 %v4614_v22, %v1129_v29  ;;  %v3796_v8 = vld [vmem:[#allocation2 + $0xc9] sm:$0xff]  ;;  %v4616_v22 = vld [vmem:[#allocation43_spill] sm:$0xff] }
 0x153   : > { %v1963_v5 = vmul.f32 %v3152_v34, %v1926_v63  ;;  %v1654_v13 = vmul.f32 %v4615_v42, %v1129_v29  ;;  %v1929_v20 = vmul.f32 %v4613_v62, %v1129_v29  ;;  %v1994_v4 = vadd.f32 %v1962_v31, %v3630_v41  ;;  %v3801_v41 = vld [vmem:[%s4384_s3 + $0x5] ss:$0 sm:$0xff]  ;;  %v1230_v31 = vpop.permute.xlu0 %1229 }
 0x154   : > { %v3773_v24 = vadd.f32 %v1455_v23, %v1354_v37  ;;  %v3780_v2 = vadd.f32 %v1790_v49, %v1719_v26  ;;  %v1892_v44 = vadd.f32 %v3637_v53, %v1821_v6  ;;  %v3785_v45 = vmul.f32 %v3720_v54, %v1289_v32 }
 0x155   : > { %v3788_v23 = vmul.f32 %v3089_v47, %v1654_v13  ;;  %v3791_v61 = vmul.f32 %v3152_v34, %v1929_v20  ;;  %v928_v29 = vmul.f32 %v4608_v38, %v3771_v33  ;;  %v1361_v57 = vadd.f32 %v1329_v25, %v1100_v52  ;;  %v1032_v25 = vld [vmem:[#allocation2 + $0xb0] sm:$0xff]  ;;  %v4618_v20 = vld [vmem:[#allocation60_spill] sm:$0xff] }
 0x156   : > { %v1995_v19 = vadd.f32 %v1963_v5, %v1892_v44  ;;  %v2033_v49 = vadd.f32 %v3186_v27, %v1994_v4  ;;  %v1696_v47 = vmul.f32 %v3801_v41, %v1659_v1  ;;  %v1762_v53 = vmul.f32 %v3778_v12, %v4601_v3  ;;  %v3814_v1 = vld [vmem:[#allocation2 + $0xb8] sm:$0xff]  ;;  %v4619_v44 = vld [vmem:[#allocation18_spill] sm:$0xff]  ;;  %v4620_v4 = vld [vmem:[#allocation69_spill] sm:$0xff] }
 0x157   : > { %v965_v0 = vmul.f32 %v3690_v51, %v928_v29  ;;  %v1494_v37 = vadd.f32 %v1462_v18, %v1361_v57  ;;  %v1797_v38 = vmul.f32 %v3127_v14, %v1760_v21  ;;  %v3810_v52 = vmul.f32 %v3673_v10, %v3681_v59 }
 0x158   : > { %v2034_v63 = vadd.f32 %v3186_v27, %v1995_v19  ;;  %v2065_v26 = vmax.f32 %v2033_v49, 0.0  ;;  %v1799_v6 = vmul.f32 %v3127_v14, %v1762_v53  ;;  %v1868_v3 = vmul.f32 %v3814_v1, %v3673_v10  ;;  %v4622_v53 = vld [vmem:[#allocation6_spill] sm:$0xff] }
 0x159   : > { %v1098_v18 = vadd.f32 %v3695_v55, %v965_v0  ;;  %v1595_v21 = vadd.f32 %v3715_v11, %v1494_v37  ;;  %v4617_v59 = vmax.f32 %v4616_v22, 0.0  ;;  %v1936_v5 = vmul.f32 %v3796_v8, %v3645_v48  ;;  %v4621_v11 = vld [vmem:[#allocation62_spill] sm:$0xff]  ;;  %v4624_v37 = vld [vmem:[#allocation35_spill] sm:$0xff]  ;;  %v4625_v22 = vld [vmem:[#allocation61_spill] sm:$0xff] }
 0x15a   : > { %v2066_v13 = vmax.f32 %v2034_v63, 0.0  ;;  %v2100_v14 = vsel %vm2090_vm2, %v4618_v20, %v2065_v26  ;;  %v931_v29 = vmul.f32 %v4620_v4, %v4619_v44  ;;  %v1069_v55 = vmul.f32 %v3655_v56, %v1032_v25  ;;  %v3835_v48 = vld [vmem:[#allocation2 + $0xcf] sm:$0xff]  ;;  %v3843_v25 = vld [vmem:[#allocation2 + $0xc0] sm:$0xff]  ;;  %v527_v4 = vpop.f32.mrf.mxu0 }
 0x15b   : > { %v1870_v32 = vmul.f32 %v3673_v10, %v4617_v59  ;;  %2132 = vst [vmem:[%s3228_s15 + $0x48] sm:$0xff] %v2100_v14  ;;  %v1359_v57 = vadd.f32 %v4621_v11, %v1098_v18  ;;  %v1728_v19 = vadd.f32 %v1696_v47, %v1595_v21  ;;  %v1973_v49 = vmul.f32 %v3152_v34, %v1936_v5  ;;  %v3847_v18 = vld [vmem:[#allocation2 + $0xd1] sm:$0xff]  ;;  %v4627_v14 = vld [vmem:[#allocation44_spill] sm:$0xff] }
 0x15c   : > { %v1293_v0 = vmul.f32 %v4622_v53, %v1230_v31  ;;  %4623 = vst [vmem:[#allocation19_spill] sm:$0xff] %v3835_v48  ;;  %v2101_v63 = vsel %vm2090_vm2, %v4624_v37, %v2066_v13  ;;  %v968_v26 = vmul.f32 %v3690_v51, %v931_v29  ;;  %v1426_v59 = vmul.f32 %v4625_v22, %v4619_v44  ;;  %v3856_v11 = vld [vmem:[%s4384_s3 + $0x3] ss:$0 sm:$0xff] }
 0x15d   : > { %v1564_v47 = vmul.f32 %v3843_v25, %v3664_v15  ;;  %4626 = vst [vmem:[#allocation55_spill] sm:$0xff] %v3847_v18  ;;  %2133 = vst [vmem:[%s3228_s15 + $0x50] sm:$0xff] %v2101_v63  ;;  %v1492_v21 = vadd.f32 %v3724_v50, %v1359_v57  ;;  %v1831_v5 = vadd.f32 %v1799_v6, %v1728_v19  ;;  %v4628_v63 = vld [vmem:[#allocation45_spill] sm:$0xff] }
 0x15e   : > { %v1330_v20 = vmul.f32 %v3720_v54, %v1293_v0  ;;  %v1660_v13 = vmul.f32 %v4627_v14, %v1230_v31  ;;  %v1101_v29 = vadd.f32 %v1069_v55, %v968_v26  ;;  %v1463_v53 = vmul.f32 %v3856_v11, %v1426_v59  ;;  %v3870_v26 = vld [vmem:[%s4384_s3 + $0x6] ss:$0 sm:$0xff] }
 0x15f   : > { %v1763_v37 = vmul.f32 %v3835_v48, %v4619_v44  ;;  %v4629_v22 = vmax.f32 %v4628_v63, 0.0  ;;  %v1593_v6 = vadd.f32 %v3710_v7, %v1492_v21  ;;  %v1902_v57 = vadd.f32 %v1870_v32, %v1831_v5  ;;  %v4630_v63 = vld [vmem:[#allocation13_spill] sm:$0xff]  ;;  %v4631_v48 = vld [vmem:[#allocation40_spill] sm:$0xff] }
 0x160   : > { %v1697_v19 = vmul.f32 %v3801_v41, %v1660_v13  ;;  %v1937_v55 = vmul.f32 %v3847_v18, %v1230_v31  ;;  %v1362_v0 = vadd.f32 %v1330_v20, %v1101_v29  ;;  %v528_v44 = vadd.f32 %v3621_v40, %v527_v4  ;;  %v4632_v29 = vld [vmem:[#allocation56_spill] sm:$0xff] }
 0x161   : > { %v1871_v50 = vmul.f32 %v3673_v10, %v4629_v22  ;;  %v1800_v59 = vmul.f32 %v3870_v26, %v1763_v37  ;;  %v924_v22 = vmul.f32 %v3729_v30, %v4630_v63  ;;  %v1726_v7 = vadd.f32 %v4631_v48, %v1593_v6 }
 0x162   : > { %v2005_v32 = vadd.f32 %v1973_v49, %v1902_v57  ;;  %v1974_v21 = vmul.f32 %v3152_v34, %v1937_v55  ;;  %v1062_v31 = vmul.f32 %v3655_v56, %v3616_v60  ;;  %v1495_v5 = vadd.f32 %v1463_v53, %v1362_v0  ;;  %v4633_v49 = vld [vmem:[#allocation15_spill] sm:$0xff] }
 0x163   : > { %v3880_v20 = vmax.f32 %v528_v44, 0.0  ;;  %v961_v13 = vmul.f32 %v3690_v51, %v924_v22  ;;  %v1286_v37 = vmul.f32 %v3745_v43, %v4632_v29  ;;  %v1829_v4 = vadd.f32 %v1797_v38, %v1726_v7  ;;  %v4634_v7 = vld [vmem:[#allocation66_spill] sm:$0xff] }
 0x164   : > { %v2044_v18 = vadd.f32 %v3186_v27, %v2005_v32  ;;  %v1353_v30 = vadd.f32 %v3583_v35, %v3589_v28  ;;  %v1421_v34 = vmul.f32 %v4633_v49, %v3771_v33  ;;  %v1596_v48 = vadd.f32 %v1564_v47, %v1495_v5 }
 0x165   : > { %668 = vst [vmem:[#allocation2 + $0x88] sm:$0xff] %v3880_v20  ;;  %v1064_v53 = vmul.f32 %v3655_v56, %v3880_v20  ;;  %v1094_v6 = vadd.f32 %v1062_v31, %v961_v13  ;;  %v1323_v57 = vmul.f32 %v3720_v54, %v1286_v37  ;;  %v1900_v55 = vadd.f32 %v1868_v3, %v1829_v4  ;;  %v4635_v31 = vld [vmem:[#allocation59_spill] sm:$0xff]  ;;  %v4636_v13 = vld [vmem:[#allocation53_spill] sm:$0xff] }
 0x166   : > { %v2076_v38 = vmax.f32 %v2044_v18, 0.0  ;;  %v1454_v0 = vmul.f32 %v3856_v11, %v3742_v17  ;;  %v3897_v28 = vmul.f32 %v3856_v11, %v1421_v34  ;;  %v1729_v35 = vadd.f32 %v1697_v19, %v1596_v48  ;;  %v607_v34 = vpop.f32.mrf.mxu1 }
 0x167   : > { %v1355_v44 = vadd.f32 %v1323_v57, %v1094_v6  ;;  %v1555_v47 = vmul.f32 %v3664_v15, %v3616_v60  ;;  %v1557_v22 = vmul.f32 %v3664_v15, %v3880_v20  ;;  %v2003_v32 = vadd.f32 %v4634_v7, %v1900_v55 }
 0x168   : > { %v2111_v3 = vsel %vm2090_vm2, %v3814_v1, %v2076_v38  ;;  %v1486_v18 = vadd.f32 %v1454_v0, %v1353_v30  ;;  %v3909_v17 = vmul.f32 %v3664_v15, %v3643_v16  ;;  %v1832_v19 = vadd.f32 %v1800_v59, %v1729_v35  ;;  %v4637_v0 = vld [vmem:[#allocation30_spill] sm:$0xff] }
 0x169   : > { %2143 = vst [vmem:[%s3228_s15 + $0xa0] sm:$0xff] %v2111_v3  ;;  %v1588_v5 = vadd.f32 %v4635_v31, %v3773_v24  ;;  %v1651_v37 = vmul.f32 %v3745_v43, %v4636_v13  ;;  %v1756_v4 = vmul.f32 %v4630_v63, %v3771_v33  ;;  %v2042_v48 = vadd.f32 %v3186_v27, %v2003_v32  ;;  %v4638_v32 = vld [vmem:[#allocation14_spill] sm:$0xff] }
 0x16a   : > { %v1587_v1 = vadd.f32 %v1555_v47, %v1486_v18  ;;  %v1758_v30 = vmul.f32 %v4633_v49, %v3625_v39  ;;  %v3923_v6 = vmul.f32 %v3673_v10, %v3880_v20  ;;  %v1903_v59 = vadd.f32 %v1871_v50, %v1832_v19  ;;  %v2434_v19 = vld [vmem:[#allocation2 + $0xa8] sm:$0xff] }
 0x16b   : > { %v1688_v24 = vmul.f32 %v3801_v41, %v1651_v37  ;;  %v1793_v57 = vmul.f32 %v3870_v26, %v1756_v4  ;;  %v3929_v43 = vmul.f32 %v3673_v10, %v3643_v16  ;;  %v2074_v33 = vmax.f32 %v2042_v48, 0.0  ;;  %v4639_v37 = vld [vmem:[#allocation63_spill] sm:$0xff] }
 0x16c   : > { %v734_v55 = vld [vmem:[#allocation2 + $0x87] sm:$0xff]  ;;  %v735_v27 = vld [vmem:[#allocation2 + $0x8f] sm:$0xff]  ;;  %v3932_v39 = vmul.f32 %v3870_v26, %v1758_v30  ;;  %v1893_v35 = vadd.f32 %v4637_v0, %v3780_v2  ;;  %v608_v50 = vadd.f32 %v3621_v40, %v607_v34  ;;  %v2006_v47 = vadd.f32 %v1974_v21, %v1903_v59  ;;  %v3949_v40 = vld [vmem:[%s4385_s4] ss:$0 sm:$0xff] }
 0x16d   : > { %v1127_v38 = vld [vmem:[#allocation2 + $0x81] sm:$0xff]  ;;  %v926_v7 = vmul.f32 %v4633_v49, %v734_v55  ;;  %v927_v3 = vmul.f32 %v4638_v32, %v735_v27  ;;  %v1128_v16 = vld [vmem:[#allocation2 + $0x89] sm:$0xff]  ;;  %v2109_v31 = vsel %vm2090_vm2, %v2434_v19, %v2074_v33  ;;  %v1419_v48 = vmul.f32 %v4630_v63, %v734_v55 }
 0x16e   : > { %v1287_v18 = vmul.f32 %v4615_v42, %v1127_v38  ;;  %v1288_v4 = vmul.f32 %v4639_v37, %v1128_v16  ;;  %v1420_v2 = vmul.f32 %v4612_v58, %v735_v27  ;;  %2141 = vst [vmem:[%s3228_s15 + $0x90] sm:$0xff] %v2109_v31  ;;  %v2045_v21 = vadd.f32 %v3949_v40, %v2006_v47 }
 0x16f   : > { %v963_v42 = vmul.f32 %v3690_v51, %v926_v7  ;;  %v964_v49 = vmul.f32 %v3690_v51, %v927_v3  ;;  %v1456_v63 = vmul.f32 %v3856_v11, %v1419_v48  ;;  %v1652_v59 = vmul.f32 %v4613_v62, %v1127_v38 }
 0x170   : > { %v1324_v34 = vmul.f32 %v3720_v54, %v1287_v18  ;;  %v1325_v30 = vmul.f32 %v3720_v54, %v1288_v4  ;;  %v1457_v58 = vmul.f32 %v3856_v11, %v1420_v2  ;;  %v2077_v33 = vmax.f32 %v2045_v21, 0.0  ;;  %v4641_v2 = vld [vmem:[#allocation48_spill] sm:$0xff] }
 0x171   : > { %v1096_v0 = vadd.f32 %v1064_v53, %v963_v42  ;;  %v1097_v32 = vadd.f32 %v3659_v46, %v964_v49  ;;  %v1488_v7 = vadd.f32 %v1456_v63, %v1355_v44  ;;  %v1653_v3 = vmul.f32 %v4632_v29, %v1128_v16  ;;  %v4643_v42 = vld [vmem:[#allocation10_spill] sm:$0xff] }
 0x172   : > { %v1356_v47 = vadd.f32 %v1324_v34, %v3761_v9  ;;  %v1689_v18 = vmul.f32 %v3801_v41, %v1652_v59  ;;  %v1720_v19 = vadd.f32 %v1688_v24, %v1587_v1  ;;  %v2112_v31 = vsel %vm2090_vm2, %v3843_v25, %v2077_v33  ;;  %v4640_v9 = vld [vmem:[#allocation11_spill] sm:$0xff]  ;;  %v4642_v1 = vld [vmem:[#allocation38_spill] sm:$0xff] }
 0x173   : > { %v1357_v37 = vadd.f32 %v1325_v30, %v1096_v0  ;;  %v1358_v4 = vadd.f32 %v3785_v45, %v1097_v32  ;;  %2144 = vst [vmem:[%s3228_s15 + $0xa8] sm:$0xff] %v2112_v31  ;;  %v1589_v53 = vadd.f32 %v1557_v22, %v1488_v7  ;;  %v1690_v46 = vmul.f32 %v3801_v41, %v1653_v3  ;;  %v4644_v45 = vld [vmem:[#allocation52_spill] sm:$0xff]  ;;  %v4648_v7 = vld [vmem:[#allocation50_spill] sm:$0xff] }
 0x174   : > { %v1489_v62 = vadd.f32 %v1457_v58, %v1356_v47  ;;  %v1721_v48 = vadd.f32 %v1689_v18, %v1588_v5  ;;  %v1754_v44 = vmul.f32 %v4640_v9, %v734_v55  ;;  %v1755_v49 = vmul.f32 %v4643_v42, %v735_v27  ;;  %v4645_v5 = vld [vmem:[#allocation33_spill] sm:$0xff] }
 0x175   : > { %v1490_v29 = vadd.f32 %v3897_v28, %v1357_v37  ;;  %v1491_v21 = vadd.f32 %v4641_v2, %v1358_v4  ;;  %v1722_v25 = vadd.f32 %v1690_v46, %v1589_v53  ;;  %v1927_v30 = vmul.f32 %v4644_v45, %v1127_v38  ;;  %v3984_v27 = vld [vmem:[%s4384_s3 + $0x8] ss:$0 sm:$0xff]  ;;  %v4651_v46 = vld [vmem:[#allocation34_spill] sm:$0xff] }
 0x176   : > { %v1590_v24 = vadd.f32 %v4642_v1, %v1489_v62  ;;  %v1791_v34 = vmul.f32 %v3870_v26, %v1754_v44  ;;  %v1928_v22 = vmul.f32 %v4636_v13, %v1128_v16  ;;  %v1792_v28 = vmul.f32 %v3870_v26, %v1755_v49  ;;  %v4646_v13 = vld [vmem:[#allocation49_spill] sm:$0xff]  ;;  %v4650_v62 = vld [vmem:[#allocation46_spill] sm:$0xff]  ;;  %v1033_v49 = vld [vmem:[#allocation2 + $0xb8] sm:$0xff] }
 0x177   : > { %v1591_v63 = vadd.f32 %v3909_v17, %v1490_v29  ;;  %v1592_v58 = vadd.f32 %v4645_v5, %v1491_v21  ;;  %v1825_v33 = vadd.f32 %v1793_v57, %v1722_v25  ;;  %v1964_v0 = vmul.f32 %v3984_v27, %v1927_v30  ;;  %v4647_v17 = vld [vmem:[#allocation8_spill] sm:$0xff]  ;;  %v4649_v37 = vld [vmem:[#allocation57_spill] sm:$0xff]  ;;  %v4652_v29 = vld [vmem:[#allocation31_spill] sm:$0xff] }
 0x178   : > { %v1723_v55 = vadd.f32 %v3788_v23, %v1590_v24  ;;  %v1823_v59 = vadd.f32 %v1791_v34, %v1720_v19  ;;  %v1965_v38 = vmul.f32 %v3984_v27, %v1928_v22  ;;  %v1824_v47 = vadd.f32 %v1792_v28, %v1721_v48  ;;  %v4655_v21 = vld [vmem:[#allocation42_spill] sm:$0xff]  ;;  %v4656_v24 = vld [vmem:[#allocation64_spill] sm:$0xff]  ;;  %v4657_v22 = vld [vmem:[#allocation9_spill] sm:$0xff] }
 0x179   : > { %v1724_v16 = vadd.f32 %v4646_v13, %v1591_v63  ;;  %v1725_v32 = vadd.f32 %v4647_v17, %v1592_v58  ;;  %v1896_v57 = vadd.f32 %v3929_v43, %v1825_v33  ;;  %v1996_v18 = vadd.f32 %v1964_v0, %v1893_v35  ;;  %v4654_v43 = vld [vmem:[#allocation39_spill] sm:$0xff]  ;;  %v4659_v33 = vld [vmem:[#allocation68_spill] sm:$0xff] }
 0x17a   : > { %v1826_v23 = vadd.f32 %v4648_v7, %v1723_v55  ;;  %v1894_v3 = vadd.f32 %v3923_v6, %v1823_v59  ;;  %v3993_v19 = vmax.f32 %v608_v50, 0.0  ;;  %v1895_v53 = vadd.f32 %v4650_v62, %v1824_v47  ;;  %v4653_v6 = vld [vmem:[#allocation21_spill] sm:$0xff]  ;;  %v4658_v5 = vld [vmem:[#allocation51_spill] sm:$0xff] }
 0x17b   : > { %v1827_v31 = vadd.f32 %v3932_v39, %v1724_v16  ;;  %v1828_v4 = vadd.f32 %v4649_v37, %v1725_v32  ;;  %v1999_v48 = vadd.f32 %v4652_v29, %v1896_v57  ;;  %v2035_v2 = vadd.f32 %v3949_v40, %v1996_v18  ;;  %v4029_v57 = vld [vmem:[#allocation2 + $0xd7] sm:$0xff]  ;;  %v4661_v37 = vld [vmem:[#allocation37_spill] sm:$0xff]  ;;  %v1238_v29 = vpop.permute.xlu0 %1237 }
 0x17c   : > { %v1897_v9 = vadd.f32 %v4651_v46, %v1826_v23  ;;  %v1997_v44 = vadd.f32 %v1965_v38, %v1894_v3  ;;  %684 = vst [vmem:[#allocation2 + $0x108] sm:$0xff] %v3993_v19  ;;  %v932_v35 = vmul.f32 %v4654_v43, %v4653_v6  ;;  %v1998_v1 = vadd.f32 %v3791_v61, %v1895_v53  ;;  %v1234_v61 = vpop.permute.xlu1 %1233  ;;  %v4660_v23 = vld [vmem:[#allocation67_spill] sm:$0xff] }
 0x17d   : > { %v1898_v50 = vadd.f32 %v3810_v52, %v1827_v31  ;;  %v1899_v39 = vadd.f32 %v4655_v21, %v1828_v4  ;;  %v2038_v34 = vadd.f32 %v3949_v40, %v1999_v48  ;;  %v2067_v45 = vmax.f32 %v2035_v2, 0.0  ;;  %v4662_v62 = vld [vmem:[#allocation47_spill] sm:$0xff]  ;;  %v1034_v48 = vld [vmem:[#allocation2 + $0xc0] sm:$0xff] }
 0x17e   : > { %v2000_v42 = vadd.f32 %v4656_v24, %v1897_v9  ;;  %v2036_v25 = vadd.f32 %v3949_v40, %v1997_v44  ;;  %v969_v30 = vmul.f32 %v3690_v51, %v932_v35  ;;  %v2037_v52 = vadd.f32 %v3949_v40, %v1998_v1  ;;  %v2437_v2 = vld [vmem:[#allocation2 + $0x98] sm:$0xff]  ;;  %v2438_v35 = vld [vmem:[#allocation2 + $0xa0] sm:$0xff] }
 0x17f   : > { %v2001_v63 = vadd.f32 %v4657_v22, %v1898_v50  ;;  %v2002_v58 = vadd.f32 %v4658_v5, %v1899_v39  ;;  %v2070_v59 = vmax.f32 %v2038_v34, 0.0  ;;  %v2102_v0 = vsel %vm2090_vm2, %v4659_v33, %v2067_v45  ;;  %v4664_v34 = vld [vmem:[#allocation61_spill] sm:$0xff] }
 0x180   : > { %v2039_v55 = vadd.f32 %v3949_v40, %v2000_v42  ;;  %v2068_v28 = vmax.f32 %v2036_v25, 0.0  ;;  %v1070_v38 = vmul.f32 %v3655_v56, %v1033_v49  ;;  %v2069_v17 = vmax.f32 %v2037_v52, 0.0  ;;  %2134 = vst [vmem:[%s3228_s15 + $0x58] sm:$0xff] %v2102_v0  ;;  %v4057_v42 = vld [vmem:[#allocation2 + $0xc8] sm:$0xff]  ;;  %v4663_v25 = vld [vmem:[#allocation20_spill] sm:$0xff]  ;;  %v4070_v52 = vld [vmem:[#allocation2 + $0xd8] sm:$0xff] }
 0x181   : > { %v2040_v13 = vadd.f32 %v3949_v40, %v2001_v63  ;;  %v2041_v16 = vadd.f32 %v3949_v40, %v2002_v58  ;;  %v2105_v7 = vsel %vm2090_vm2, %v3880_v20, %v2070_v59  ;;  %v1294_v3 = vmul.f32 %v4660_v23, %v1234_v61  ;;  %v4067_v63 = vld [vmem:[#allocation2 + $0xe1] sm:$0xff]  ;;  %v4666_v0 = vld [vmem:[#allocation55_spill] sm:$0xff] }
 0x182   : > { %v2071_v32 = vmax.f32 %v2039_v55, 0.0  ;;  %v2103_v47 = vsel %vm2090_vm2, %v3616_v60, %v2068_v28  ;;  %v2104_v4 = vsel %vm2090_vm2, %v4661_v37, %v2069_v17  ;;  %2137 = vst [vmem:[%s3228_s15 + $0x70] sm:$0xff] %v2105_v7  ;;  %v4039_v60 = vld [vmem:[#allocation2 + $0xd9] sm:$0xff]  ;;  %v1102_v20 = vadd.f32 %v1070_v38, %v969_v30 }
 0x183   : > { %v2072_v18 = vmax.f32 %v2040_v13, 0.0  ;;  %v2073_v31 = vmax.f32 %v2041_v16, 0.0  ;;  %2135 = vst [vmem:[%s3228_s15 + $0x60] sm:$0xff] %v2103_v47  ;;  %2136 = vst [vmem:[%s3228_s15 + $0x68] sm:$0xff] %v2104_v4  ;;  %v1331_v46 = vmul.f32 %v3720_v54, %v1294_v3  ;;  %v1427_v9 = vmul.f32 %v3778_v12, %v4653_v6  ;;  %v1242_v13 = vpop.permute.xlu1 %1241  ;;  %v1035_v16 = vld [vmem:[#allocation2 + $0xc8] sm:$0xff]  ;;  %v4667_v4 = vld [vmem:[#allocation22_spill] sm:$0xff] }
 0x184   : > { %v2106_v53 = vsel %vm2090_vm2, %v4662_v62, %v2071_v32  ;;  %v1661_v44 = vmul.f32 %v3796_v8, %v1234_v61  ;;  %v1764_v21 = vmul.f32 %v4029_v57, %v4653_v6  ;;  %v1938_v24 = vmul.f32 %v4039_v60, %v1234_v61  ;;  %v4065_v6 = vld [vmem:[#allocation2 + $0xdf] sm:$0xff] }
 0x185   : > { %2138 = vst [vmem:[%s3228_s15 + $0x78] sm:$0xff] %v2106_v53  ;;  %v2107_v43 = vsel %vm2090_vm2, %v2437_v2, %v2072_v18  ;;  %v2108_v50 = vsel %vm2090_vm2, %v2438_v35, %v2073_v31  ;;  %v1363_v39 = vadd.f32 %v1331_v46, %v1102_v20  ;;  %v1464_v1 = vmul.f32 %v3856_v11, %v1427_v9  ;;  %v4665_v61 = vld [vmem:[#allocation19_spill] sm:$0xff]  ;;  %v4085_v18 = vld [vmem:[#allocation2 + $0xe0] sm:$0xff]  ;;  %v4087_v31 = vld [vmem:[#allocation2 + $0xd0] sm:$0xff] }
 0x186   : > { %2139 = vst [vmem:[%s3228_s15 + $0x80] sm:$0xff] %v2107_v43  ;;  %2140 = vst [vmem:[%s3228_s15 + $0x88] sm:$0xff] %v2108_v50  ;;  %v1565_v49 = vmul.f32 %v4057_v42, %v3664_v15  ;;  %v933_v45 = vmul.f32 %v4664_v34, %v4663_v25  ;;  %v1071_v30 = vmul.f32 %v3655_v56, %v1034_v48  ;;  %v4099_v2 = vld [vmem:[#allocation2 + $0xe7] sm:$0xff]  ;;  %v1246_v34 = vpop.permute.xlu0 %1245 }
 0x187   : > { %v1295_v22 = vmul.f32 %v4627_v14, %v1238_v29  ;;  %v1496_v5 = vadd.f32 %v1464_v1, %v1363_v39  ;;  %v1698_v58 = vmul.f32 %v3801_v41, %v1661_v44  ;;  %v1872_v55 = vmul.f32 %v4070_v52, %v3673_v10  ;;  %v4103_v35 = vld [vmem:[#allocation2 + $0xe9] sm:$0xff] }
 0x188   : > { %v1428_v28 = vmul.f32 %v4665_v61, %v4663_v25  ;;  %v1801_v59 = vmul.f32 %v3870_v26, %v1764_v21  ;;  %v970_v33 = vmul.f32 %v3690_v51, %v933_v45  ;;  %v1662_v38 = vmul.f32 %v4666_v0, %v1238_v29 }
 0x189   : > { %v1332_v14 = vmul.f32 %v3720_v54, %v1295_v22  ;;  %v1597_v17 = vadd.f32 %v1565_v49, %v1496_v5  ;;  %v1975_v32 = vmul.f32 %v3984_v27, %v1938_v24  ;;  %v1765_v47 = vmul.f32 %v4065_v6, %v4663_v25 }
 0x18a   : > { %v1939_v7 = vmul.f32 %v4067_v63, %v1238_v29  ;;  %v1103_v23 = vadd.f32 %v1071_v30, %v970_v33  ;;  %v1465_v3 = vmul.f32 %v3856_v11, %v1428_v28  ;;  %v1566_v37 = vmul.f32 %v4087_v31, %v3664_v15 }
 0x18b   : > { %v934_v62 = vmul.f32 %v3778_v12, %v4667_v4  ;;  %v1730_v53 = vadd.f32 %v1698_v58, %v1597_v17  ;;  %v1873_v20 = vmul.f32 %v3673_v10, %v4085_v18  ;;  %v1072_v46 = vmul.f32 %v3655_v56, %v1035_v16  ;;  %v4669_v16 = vld [vmem:[#allocation32_spill] sm:$0xff] }
 0x18c   : > { %v1296_v9 = vmul.f32 %v3796_v8, %v1242_v13  ;;  %v1364_v44 = vadd.f32 %v1332_v14, %v1103_v23  ;;  %v1699_v29 = vmul.f32 %v3801_v41, %v1662_v38  ;;  %v1429_v43 = vmul.f32 %v4029_v57, %v4667_v4  ;;  %v1036_v8 = vld [vmem:[#allocation2 + $0xd0] sm:$0xff] }
 0x18d   : > { %v971_v48 = vmul.f32 %v3690_v51, %v934_v62  ;;  %v1833_v12 = vadd.f32 %v1801_v59, %v1730_v53  ;;  %v1802_v50 = vmul.f32 %v3870_v26, %v1765_v47  ;;  %v1976_v21 = vmul.f32 %v3984_v27, %v1939_v7  ;;  %v4668_v59 = vld [vmem:[#allocation23_spill] sm:$0xff] }
 0x18e   : > { %v1333_v39 = vmul.f32 %v3720_v54, %v1296_v9  ;;  %v1497_v1 = vadd.f32 %v1465_v3, %v1364_v44  ;;  %v1567_v49 = vmul.f32 %v4070_v52, %v3664_v15  ;;  %v1663_v25 = vmul.f32 %v4039_v60, %v1242_v13  ;;  %v4132_v44 = vld [vmem:[#allocation2 + $0xf1] sm:$0xff] }
 0x18f   : > { %v1104_v24 = vadd.f32 %v1072_v46, %v971_v48  ;;  %v1904_v45 = vadd.f32 %v1872_v55, %v1833_v12  ;;  %v1466_v30 = vmul.f32 %v3856_v11, %v1429_v43  ;;  %v1766_v22 = vmul.f32 %v4099_v2, %v4667_v4 }
 0x190   : > { %v1940_v5 = vmul.f32 %v4103_v35, %v1242_v13  ;;  %v1598_v58 = vadd.f32 %v1566_v37, %v1497_v1  ;;  %v935_v33 = vmul.f32 %v4665_v61, %v4668_v59  ;;  %v1073_v14 = vmul.f32 %v3655_v56, %v1036_v8  ;;  %v4125_v37 = vld [vmem:[#allocation2 + $0xef] sm:$0xff]  ;;  %v1250_v8 = vpop.permute.xlu1 %1249 }
 0x191   : > { %v1365_v28 = vadd.f32 %v1333_v39, %v1104_v24  ;;  %v2007_v38 = vadd.f32 %v1975_v32, %v1904_v45  ;;  %v1874_v17 = vmul.f32 %v3673_v10, %v4669_v16  ;;  %v1297_v55 = vmul.f32 %v4666_v0, %v1246_v34 }
 0x192   : > { %v1430_v47 = vmul.f32 %v4065_v6, %v4668_v59  ;;  %v1731_v7 = vadd.f32 %v1699_v29, %v1598_v58  ;;  %v1700_v13 = vmul.f32 %v3801_v41, %v1663_v25  ;;  %v972_v3 = vmul.f32 %v3690_v51, %v935_v33  ;;  %v1037_v29 = vld [vmem:[#allocation2 + $0xd8] sm:$0xff] }
 0x193   : > { %v1498_v23 = vadd.f32 %v1466_v30, %v1365_v28  ;;  %v2046_v61 = vadd.f32 %v3949_v40, %v2007_v38  ;;  %v1803_v32 = vmul.f32 %v3870_v26, %v1766_v22  ;;  %v1334_v4 = vmul.f32 %v3720_v54, %v1297_v55  ;;  %v4670_v30 = vld [vmem:[#allocation24_spill] sm:$0xff] }
 0x194   : > { %v1664_v62 = vmul.f32 %v4067_v63, %v1246_v34  ;;  %v1834_v0 = vadd.f32 %v1802_v50, %v1731_v7  ;;  %v1977_v46 = vmul.f32 %v3984_v27, %v1940_v5  ;;  %v1105_v9 = vadd.f32 %v1073_v14, %v972_v3  ;;  %v4159_v7 = vld [vmem:[#allocation2 + $0xf7] sm:$0xff] }
 0x195   : > { %v1599_v53 = vadd.f32 %v1567_v49, %v1498_v23  ;;  %v2078_v48 = vmax.f32 %v2046_v61, 0.0  ;;  %v1467_v43 = vmul.f32 %v3856_v11, %v1430_v47  ;;  %v1568_v12 = vmul.f32 %v3664_v15, %v4085_v18  ;;  %v4161_v23 = vld [vmem:[#allocation2 + $0xf9] sm:$0xff] }
 0x196   : > { %v1767_v39 = vmul.f32 %v4125_v37, %v4668_v59  ;;  %v1905_v1 = vadd.f32 %v1873_v20, %v1834_v0  ;;  %v1366_v24 = vadd.f32 %v1334_v4, %v1105_v9  ;;  %v1701_v49 = vmul.f32 %v3801_v41, %v1664_v62  ;;  %v4148_v20 = vld [vmem:[#allocation2 + $0xf0] sm:$0xff]  ;;  %v1254_v0 = vpop.permute.xlu0 %1253 }
 0x197   : > { %v1732_v50 = vadd.f32 %v1700_v13, %v1599_v53  ;;  %v2113_v25 = vsel %vm2090_vm2, %v4057_v42, %v2078_v48  ;;  %v1941_v45 = vmul.f32 %v4132_v44, %v1246_v34  ;;  %v936_v22 = vmul.f32 %v4029_v57, %v4670_v30  ;;  %v4671_v48 = vld [vmem:[#allocation25_spill] sm:$0xff] }
 0x198   : > { %v1074_v5 = vmul.f32 %v3655_v56, %v1037_v29  ;;  %2145 = vst [vmem:[%s3228_s15 + $0xb0] sm:$0xff] %v2113_v25  ;;  %v2008_v58 = vadd.f32 %v1976_v21, %v1905_v1  ;;  %v1499_v59 = vadd.f32 %v1467_v43, %v1366_v24  ;;  %v1298_v33 = vmul.f32 %v4039_v60, %v1250_v8  ;;  %v4672_v25 = vld [vmem:[#allocation16_spill] sm:$0xff] }
 0x199   : > { %v1835_v28 = vadd.f32 %v1803_v32, %v1732_v50  ;;  %v1804_v14 = vmul.f32 %v3870_v26, %v1767_v39  ;;  %v1875_v42 = vmul.f32 %v3673_v10, %v4148_v20  ;;  %v973_v34 = vmul.f32 %v3690_v51, %v936_v22 }
 0x19a   : > { %v1431_v57 = vmul.f32 %v4099_v2, %v4670_v30  ;;  %v2047_v38 = vadd.f32 %v3949_v40, %v2008_v58  ;;  %v1600_v21 = vadd.f32 %v1568_v12, %v1499_v59  ;;  %v1335_v47 = vmul.f32 %v3720_v54, %v1298_v33 }
 0x19b   : > { %v1906_v55 = vadd.f32 %v1874_v17, %v1835_v28  ;;  %v1978_v60 = vmul.f32 %v3984_v27, %v1941_v45  ;;  %v1106_v13 = vadd.f32 %v1074_v5, %v973_v34  ;;  %v1569_v3 = vmul.f32 %v3664_v15, %v4669_v16  ;;  %v4188_v5 = vld [vmem:[#allocation2 + $0xff] sm:$0xff] }
 0x19c   : > { %v1665_v61 = vmul.f32 %v4103_v35, %v1250_v8  ;;  %v2079_v32 = vmax.f32 %v2047_v38, 0.0  ;;  %v1733_v62 = vadd.f32 %v1701_v49, %v1600_v21  ;;  %v1468_v17 = vmul.f32 %v3856_v11, %v1431_v57 }
 0x19d   : > { %v2009_v4 = vadd.f32 %v1977_v46, %v1906_v55  ;;  %v1367_v53 = vadd.f32 %v1335_v47, %v1106_v13  ;;  %v1768_v9 = vmul.f32 %v4159_v7, %v4670_v30  ;;  %v1942_v29 = vmul.f32 %v4161_v23, %v1250_v8  ;;  %v4203_v47 = vld [vmem:[#allocation2 + $0x101] sm:$0xff]  ;;  %v4673_v13 = vld [vmem:[#allocation26_spill] sm:$0xff] }
 0x19e   : > { %v937_v43 = vmul.f32 %v4065_v6, %v4671_v48  ;;  %v2114_v16 = vsel %vm2090_vm2, %v4087_v31, %v2079_v32  ;;  %v1836_v46 = vadd.f32 %v1804_v14, %v1733_v62  ;;  %v1075_v39 = vmul.f32 %v3655_v56, %v4085_v18  ;;  %v4196_v14 = vpop.permute.xlu1 %1257 }
 0x19f   : > { %v2048_v12 = vadd.f32 %v3949_v40, %v2009_v4  ;;  %2146 = vst [vmem:[%s3228_s15 + $0xb8] sm:$0xff] %v2114_v16  ;;  %v1500_v1 = vadd.f32 %v1468_v17, %v1367_v53  ;;  %v1702_v50 = vmul.f32 %v3801_v41, %v1665_v61  ;;  %v1299_v8 = vmul.f32 %v4067_v63, %v1254_v0  ;;  %v4210_v4 = vld [vmem:[#allocation2 + $0x100] sm:$0xff] }
 0x1a0   : > { %v974_v24 = vmul.f32 %v3690_v51, %v937_v43  ;;  %v1907_v49 = vadd.f32 %v1875_v42, %v1836_v46  ;;  %v1876_v31 = vmul.f32 %v3673_v10, %v4672_v25  ;;  %v1432_v45 = vmul.f32 %v4125_v37, %v4671_v48  ;;  %v1039_v42 = vld [vmem:[#allocation2 + $0xe8] sm:$0xff] }
 0x1a1   : > { %v2080_v6 = vmax.f32 %v2048_v12, 0.0  ;;  %v1601_v30 = vadd.f32 %v1569_v3, %v1500_v1  ;;  %v1336_v18 = vmul.f32 %v3720_v54, %v1299_v8  ;;  %v1666_v58 = vmul.f32 %v4132_v44, %v1254_v0  ;;  %v1403_v46 = vld [vmem:[#allocation2 + $0x107] sm:$0xff] }
 0x1a2   : > { %v1107_v22 = vadd.f32 %v1075_v39, %v974_v24  ;;  %v2010_v28 = vadd.f32 %v1978_v60, %v1907_v49  ;;  %v1805_v59 = vmul.f32 %v3870_v26, %v1768_v9  ;;  %v1979_v33 = vmul.f32 %v3984_v27, %v1942_v29  ;;  %v4222_v39 = vpop.permute.xlu0 %1261 }
 0x1a3   : > { %v2115_v63 = vsel %vm2090_vm2, %v4070_v52, %v2080_v6  ;;  %v1734_v34 = vadd.f32 %v1702_v50, %v1601_v30  ;;  %v1469_v38 = vmul.f32 %v3856_v11, %v1432_v45  ;;  %v1570_v55 = vmul.f32 %v3664_v15, %v4148_v20 }
 0x1a4   : > { %2147 = vst [vmem:[%s3228_s15 + $0xc0] sm:$0xff] %v2115_v63  ;;  %v1368_v57 = vadd.f32 %v1336_v18, %v1107_v22  ;;  %v2049_v21 = vadd.f32 %v3949_v40, %v2010_v28  ;;  %v1703_v52 = vmul.f32 %v3801_v41, %v1666_v58  ;;  %v1769_v60 = vmul.f32 %v4188_v5, %v4671_v48 }
 0x1a5   : > { %v938_v3 = vmul.f32 %v4099_v2, %v4673_v13  ;;  %v1837_v61 = vadd.f32 %v1805_v59, %v1734_v34  ;;  %v1076_v62 = vmul.f32 %v3655_v56, %v1039_v42  ;;  %v1300_v17 = vmul.f32 %v4103_v35, %v4196_v14  ;;  %v2442_v35 = vld [vmem:[#allocation2 + $0xe0] sm:$0xff] }
 0x1a6   : > { %v1501_v32 = vadd.f32 %v1469_v38, %v1368_v57  ;;  %v2081_v53 = vmax.f32 %v2049_v21, 0.0  ;;  %v1877_v9 = vmul.f32 %v3673_v10, %v4210_v4  ;;  %v1433_v48 = vmul.f32 %v4159_v7, %v4673_v13 }
 0x1a7   : > { %v975_v29 = vmul.f32 %v3690_v51, %v938_v3  ;;  %v1908_v2 = vadd.f32 %v1876_v31, %v1837_v61  ;;  %v1943_v16 = vmul.f32 %v4203_v47, %v1254_v0  ;;  %v1337_v12 = vmul.f32 %v3720_v54, %v1300_v17  ;;  %v4674_v31 = vld [vmem:[#allocation27_spill] sm:$0xff]  ;;  %v4675_v3 = vld [vmem:[#allocation28_spill] sm:$0xff] }
 0x1a8   : > { %v1602_v43 = vadd.f32 %v1570_v55, %v1501_v32  ;;  %v2116_v1 = vsel %vm2090_vm2, %v2442_v35, %v2081_v53  ;;  %v1806_v50 = vmul.f32 %v3870_v26, %v1769_v60  ;;  %v1470_v8 = vmul.f32 %v3856_v11, %v1433_v48  ;;  %v2443_v32 = vld [vmem:[#allocation2 + $0xe8] sm:$0xff] }
 0x1a9   : > { %v1108_v24 = vadd.f32 %v1076_v62, %v975_v29  ;;  %2148 = vst [vmem:[%s3228_s15 + $0xc8] sm:$0xff] %v2116_v1  ;;  %v2011_v6 = vadd.f32 %v1979_v33, %v1908_v2  ;;  %v1667_v0 = vmul.f32 %v4161_v23, %v4196_v14  ;;  %v939_v45 = vmul.f32 %v4125_v37, %v4674_v31 }
 0x1aa   : > { %v1735_v49 = vadd.f32 %v1703_v52, %v1602_v43  ;;  %v1770_v22 = vmul.f32 %v1403_v46, %v4673_v13  ;;  %v1077_v18 = vmul.f32 %v3655_v56, %v4148_v20  ;;  %v1301_v58 = vmul.f32 %v4132_v44, %v4222_v39  ;;  %v4250_v13 = vpop.permute.xlu1 %1265 }
 0x1ab   : > { %v1369_v30 = vadd.f32 %v1337_v12, %v1108_v24  ;;  %v2050_v63 = vadd.f32 %v3949_v40, %v2011_v6  ;;  %v1980_v59 = vmul.f32 %v3984_v27, %v1943_v16  ;;  %v976_v33 = vmul.f32 %v3690_v51, %v939_v45 }
 0x1ac   : > { %v1838_v28 = vadd.f32 %v1806_v50, %v1735_v49  ;;  %v1571_v37 = vmul.f32 %v3664_v15, %v4672_v25  ;;  %v1338_v34 = vmul.f32 %v3720_v54, %v1301_v58  ;;  %v1434_v57 = vmul.f32 %v4188_v5, %v4674_v31  ;;  %v1270_v58 = vpop.permute.xlu0 %1269 }
 0x1ad   : > { %v1502_v42 = vadd.f32 %v1470_v8, %v1369_v30  ;;  %v2082_v20 = vmax.f32 %v2050_v63, 0.0  ;;  %v1704_v44 = vmul.f32 %v3801_v41, %v1667_v0  ;;  %v1109_v55 = vadd.f32 %v1077_v18, %v976_v33 }
 0x1ae   : > { %v1909_v38 = vadd.f32 %v1877_v9, %v1838_v28  ;;  %v1807_v52 = vmul.f32 %v3870_v26, %v1770_v22  ;;  %v1668_v60 = vmul.f32 %v4203_v47, %v4222_v39  ;;  %v940_v61 = vmul.f32 %v4159_v7, %v4675_v3  ;;  %v1404_v9 = vld [vmem:[#allocation2 + $0x10f] sm:$0xff] }
 0x1af   : > { %v1603_v21 = vadd.f32 %v1571_v37, %v1502_v42  ;;  %v2117_v62 = vsel %vm2090_vm2, %v2443_v32, %v2082_v20  ;;  %v1370_v53 = vadd.f32 %v1338_v34, %v1109_v55  ;;  %v1471_v29 = vmul.f32 %v3856_v11, %v1434_v57  ;;  %v1537_v20 = vld [vmem:[#allocation2 + $0x110] sm:$0xff]  ;;  %v2448_v32 = vld [vmem:[#allocation2] sm:$0xff] }
 0x1b0   : > { %v2012_v17 = vadd.f32 %v1980_v59, %v1909_v38  ;;  %2149 = vst [vmem:[%s3228_s15 + $0xd0] sm:$0xff] %v2117_v62  ;;  %v1572_v2 = vmul.f32 %v3664_v15, %v4210_v4  ;;  %v977_v43 = vmul.f32 %v3690_v51, %v940_v61  ;;  %v1078_v16 = vmul.f32 %v3655_v56, %v4672_v25  ;;  %v1637_v15 = vld [vmem:[#allocation2 + $0x109] sm:$0xff]  ;;  %v1740_v25 = vld [vmem:[#allocation2 + $0x117] sm:$0xff] }
 0x1b1   : > { %v1736_v48 = vadd.f32 %v1704_v44, %v1603_v21  ;;  %v1503_v12 = vadd.f32 %v1471_v29, %v1370_v53  ;;  %v1302_v35 = vmul.f32 %v4161_v23, %v4250_v13  ;;  %v1435_v1 = vmul.f32 %v1403_v46, %v4675_v3  ;;  %v2444_v46 = vld [vmem:[#allocation2 + $0xf0] sm:$0xff]  ;;  %v4676_v59 = vld [vmem:[#allocation29_spill] sm:$0xff]  ;;  %v1914_v44 = vld [vmem:[#allocation2 + $0x119] sm:$0xff] }
 0x1b2   : > { %v2051_v7 = vadd.f32 %v3949_v40, %v2012_v17  ;;  %v1705_v24 = vmul.f32 %v3801_v41, %v1668_v60  ;;  %v1771_v8 = vmul.f32 %v1404_v9, %v4674_v31  ;;  %v1110_v49 = vadd.f32 %v1078_v16, %v977_v43  ;;  %v1638_v60 = vld [vmem:[#allocation2 + $0x111] sm:$0xff] }
 0x1b3   : > { %v1839_v50 = vadd.f32 %v1807_v52, %v1736_v48  ;;  %v1604_v51 = vadd.f32 %v1572_v2, %v1503_v12  ;;  %v1339_v56 = vmul.f32 %v3720_v54, %v1302_v35  ;;  %v1472_v0 = vmul.f32 %v3856_v11, %v1435_v1  ;;  %v1741_v2 = vld [vmem:[#allocation2 + $0x11f] sm:$0xff] }
 0x1b4   : > { %v2083_v6 = vmax.f32 %v2051_v7, 0.0  ;;  %v1669_v45 = vmul.f32 %v1637_v15, %v4250_v13  ;;  %v1878_v23 = vmul.f32 %v3673_v10, %v3993_v19  ;;  %v1944_v18 = vmul.f32 %v1637_v15, %v4196_v14  ;;  %v2445_v10 = vld [vmem:[%s4384_s3 + $0x4] ss:$0 sm:$0xff]  ;;  %v2446_v14 = vld [vmem:[%s4384_s3 + $0x1] ss:$0 sm:$0xff] }
 0x1b5   : > { %v1737_v31 = vadd.f32 %v1705_v24, %v1604_v51  ;;  %v1371_v22 = vadd.f32 %v1339_v56, %v1110_v49  ;;  %v1808_v54 = vmul.f32 %v3870_v26, %v1771_v8  ;;  %v1772_v63 = vmul.f32 %v1740_v25, %v4675_v3 }
 0x1b6   : > { %v2118_v30 = vsel %vm2090_vm2, %v2444_v46, %v2083_v6  ;;  %v1910_v28 = vadd.f32 %v1878_v23, %v1839_v50  ;;  %v941_v33 = vmul.f32 %v4188_v5, %v4676_v59  ;;  %v1573_v37 = vmul.f32 %v2445_v10, %v3993_v19  ;;  %v2447_v5 = vld [vmem:[%s4384_s3] ss:$0 sm:$0xff] }
 0x1b7   : > { %2150 = vst [vmem:[%s3228_s15 + $0xd8] sm:$0xff] %v2118_v30  ;;  %v1504_v42 = vadd.f32 %v1472_v0, %v1371_v22  ;;  %v1981_v34 = vmul.f32 %v3984_v27, %v1944_v18  ;;  %v1079_v57 = vmul.f32 %v2446_v14, %v4210_v4  ;;  %v1840_v38 = vadd.f32 %v1808_v54, %v1737_v31  ;;  %v2449_v4 = vld [vmem:[%s4384_s3 + $0x7] ss:$0 sm:$0xff]  ;;  %v2451_v0 = vld [vmem:[#allocation2 + $0xf8] sm:$0xff] }
 0x1b8   : > { %v978_v55 = vmul.f32 %v2447_v5, %v941_v33  ;;  %v1303_v21 = vmul.f32 %v4203_v47, %v1270_v58  ;;  %v1436_v52 = vmul.f32 %v1404_v9, %v4676_v59  ;;  %v1706_v61 = vmul.f32 %v3801_v41, %v1669_v45  ;;  %v2450_v47 = vld [vmem:[%s4384_s3 + $0x2] ss:$0 sm:$0xff] }
 0x1b9   : > { %v1605_v3 = vadd.f32 %v1573_v37, %v1504_v42  ;;  %v1880_v62 = vmul.f32 %v2449_v4, %v2448_v32  ;;  %v2013_v17 = vadd.f32 %v1981_v34, %v1910_v28  ;;  %v1809_v53 = vmul.f32 %v3870_v26, %v1772_v63  ;;  %v1915_v45 = vld [vmem:[#allocation2 + $0x121] sm:$0xff] }
 0x1ba   : > { %v1111_v29 = vadd.f32 %v1079_v57, %v978_v55  ;;  %v1340_v48 = vmul.f32 %v2450_v47, %v1303_v21  ;;  %v1879_v9 = vmul.f32 %v2449_v4, %v1537_v20  ;;  %v1946_v16 = vmul.f32 %v1914_v44, %v4250_v13  ;;  %v2452_v42 = vld [vmem:[#allocation2 + $0x100] sm:$0xff] }
 0x1bb   : > { %v1738_v43 = vadd.f32 %v1706_v61, %v1605_v3  ;;  %v2052_v7 = vadd.f32 %v3949_v40, %v2013_v17  ;;  %v1945_v12 = vmul.f32 %v1638_v60, %v4222_v39  ;;  %v1473_v1 = vmul.f32 %v3856_v11, %v1436_v52 }
 0x1bc   : > { %v1372_v35 = vadd.f32 %v1340_v48, %v1111_v29  ;;  %v1670_v50 = vmul.f32 %v1638_v60, %v1270_v58  ;;  %v1911_v24 = vadd.f32 %v1879_v9, %v1840_v38  ;;  %v1773_v51 = vmul.f32 %v1741_v2, %v4676_v59 }
 0x1bd   : > { %v1841_v8 = vadd.f32 %v1809_v53, %v1738_v43  ;;  %v2084_v15 = vmax.f32 %v2052_v7, 0.0  ;;  %v1982_v6 = vmul.f32 %v3984_v27, %v1945_v12  ;;  %v1574_v56 = vmul.f32 %v2445_v10, %v1537_v20 }
 0x1be   : > { %v1505_v49 = vadd.f32 %v1473_v1, %v1372_v35  ;;  %v1983_v13 = vmul.f32 %v3984_v27, %v1946_v16  ;;  %v1707_v46 = vmul.f32 %v3801_v41, %v1670_v50  ;;  %v1810_v22 = vmul.f32 %v3870_v26, %v1773_v51 }
 0x1bf   : > { %v1912_v25 = vadd.f32 %v1880_v62, %v1841_v8  ;;  %v2119_v39 = vsel %vm2090_vm2, %v2451_v0, %v2084_v15  ;;  %v2014_v23 = vadd.f32 %v1982_v6, %v1911_v24  ;;  %v1947_v54 = vmul.f32 %v1915_v45, %v1270_v58 }
 0x1c0   : > { %2151 = vst [vmem:[%s3228_s15 + $0xe0] sm:$0xff] %v2119_v39  ;;  %v1606_v11 = vadd.f32 %v1574_v56, %v1505_v49 }
 0x1c1   : > { %v2015_v30 = vadd.f32 %v1983_v13, %v1912_v25  ;;  %v2053_v31 = vadd.f32 %v3949_v40, %v2014_v23  ;;  %v1984_v37 = vmul.f32 %v3984_v27, %v1947_v54  ;;  %v2453_v27 = vld [vmem:[#allocation2 + $0x110] sm:$0xff] }
 0x1c2   : > { %v1739_v18 = vadd.f32 %v1707_v46, %v1606_v11 }
 0x1c3   : > { %v2054_v63 = vadd.f32 %v3949_v40, %v2015_v30  ;;  %v2085_v28 = vmax.f32 %v2053_v31, 0.0 }
 0x1c4   : > { %v1842_v59 = vadd.f32 %v1810_v22, %v1739_v18 }
 0x1c5   : > { %v2086_v33 = vmax.f32 %v2054_v63, 0.0  ;;  %v2120_v41 = vsel %vm2090_vm2, %v2452_v42, %v2085_v28 }
 0x1c6   : > { %v1913_v10 = vadd.f32 %v1880_v62, %v1842_v59  ;;  %2152 = vst [vmem:[%s3228_s15 + $0xe8] sm:$0xff] %v2120_v41 }
 0x1c7   : > { %v2121_v26 = vsel %vm2090_vm2, %v3993_v19, %v2086_v33 }
 0x1c8   : > { %2153 = vst [vmem:[%s3228_s15 + $0xf0] sm:$0xff] %v2121_v26  ;;  %v2016_v58 = vadd.f32 %v1984_v37, %v1913_v10 }
 0x1ca   : > { %v2055_v34 = vadd.f32 %v3949_v40, %v2016_v58 }
 0x1cc   : > { %v2087_v14 = vmax.f32 %v2055_v34, 0.0 }
 0x1ce   : > { %v2122_v19 = vsel %vm2090_vm2, %v2453_v27, %v2087_v14 }
 0x1cf   : > { %2154 = vst [vmem:[%s3228_s15 + $0xf8] sm:$0xff] %v2122_v19 }
 0x1d0   : > { %2467 = shalt.err (!%p2464_p3)
}
 0x1d1   : > { %s2468_s12 = scalar_lea.hbm %s4332_s13, 4096  ;;  %s2472_s19 = scalar_lea.hbm %s4387_s6, 8192 }
 0x1d2   : > { %p2469_p4 = scmp.ne.s32.totalorder %s4332_s13, %s2468_s12  ;;  %p2473_p9 = scmp.lt.s32.totalorder %s4332_s13, %s4387_s6 }
 0x1d3   : > { %p2474_p10 = scmp.lt.s32.totalorder %s2472_s19, %s2468_s12 }
 0x1d4   : > { %p2470_p7 = pnand %p2469_p4, %p2595_p5 }
 0x1d5   : > { %p2475_p11 = por %p2474_p10, %p2473_p9 }
 0x1d6   : > { %p2471_p8 = pneg %p2470_p7 }
 0x1d8   : > { %p2476_p12 = pnand %p2475_p11, %p2471_p8 }
 0x1da   : > { %2479 = shalt.err (!%p2476_p12)
}
 0x1db   : > { %s2520_s28 = smov 128   ;;  %s2521_s10 = smov 8  }
 0x1dc   : > { %2374 = dma.vmem_to_hbm [thread:$0]  (%p2595_p5), %s4334_s9, 4096, %s4332_s13, %s4341_s25, %s2520_s28, %s2520_s28, %s2521_s10  }
 0x1dd PF: > { %p2380_p13 = scmp.ge.s32.totalorder %s2514_s24, 2  ;;  %s2184_s11 = sand.u32 1, %s2502_s21  }
 0x1de   : > { %s2185_s14 = scalar_lea.sflag [#allocation4], %s2184_s11 }
 0x1df   : > { %p2377_p0 = pnand %p2380_p13, %p2599_p6 }
 0x1e1   : > { %p2378_p1 = pneg %p2377_p0 }
 0x1e3   : > { %2497 = dma.done.wait (%p2378_p1), %s2185_s14, 4096  }
 0x1e4   : > { %2499 = vsyncadd (%p2378_p1), %s2185_s14, 4294963200  ;;  %p16_p2 = scmp.ge.s32.totalorder %s2582_s27, 4   ;;  %s4677_s21 = smov %s2506_s22 }
 0x1e5   : > { %s4678_s22 = smov %s2510_s23  ;;  %s4679_s23 = smov %s2593_s30 }
 0x1e6   : > { %s4680_s24 = smov %s2582_s27  ;;  %18 = sbr.rel (!%p16_p2) target bundleno = 3 (0x3), region = 79 }
 0x1eb   :  { %2190 = vsyncpa [#allocation4], 1 }
 0x1ec   :  { %2192 = vsyncpa [#allocation4 + $0x1], 1 }

</bundles_post_ra>
